<compile_context>
chip_gen: v6e
topology: v6e:2x2x1
jax: 0.10.0
libtpu: 0.0.40
codegen_flags: <defaults>
</compile_context>

<pallas_src>
import math
import numpy as np
import jax
import jax.numpy as jnp
from jax import lax
from jax.experimental import pallas as pl
from jax.experimental.pallas import tpu as pltpu

# ----- TFC_LaSAFT.__init__ hyper-parameters (small synthetic sizes) ----------
IN_CHANNELS   = 4
NUM_LAYERS    = 2
GR            = 4          # growth rate == TFC output channels
KT            = 3          # temporal kernel size
KF            = 3          # frequency kernel size
F_BINS        = 16         # 'f': number of frequency bins
BN_FACTOR     = 16
MIN_BN_UNITS  = 8
CONDITION_DIM = 6
NUM_TDFS      = 4
DK            = 8

BATCH    = 2
T_FRAMES = 8
BN_EPS   = 1e-5
BN_UNITS = max((F_BINS * NUM_TDFS) // BN_FACTOR, MIN_BN_UNITS)
DK_SQRT  = math.sqrt(DK)
TF_LANES = T_FRAMES * F_BINS             # 128 -> exactly one full lane group
CD_PAD   = (-(CONDITION_DIM + 1)) % 8    # pad the (cond, bias) contraction to 8

HI = jax.lax.Precision.HIGHEST           # reference / wrapper matmul precision

# Original code uses Conv2d(kernel_size=(kf, kt), padding=(kt//2, kf//2)),
# which is only a "same" conv when kt == kf (true in all lasaft configs).
assert KT == KF
# NOTE: BatchNorm2d is implemented in eval mode (running stats folded into a
# per-channel scale/shift).  TODO(synk): training-mode batch statistics.
# NOTE: everything stays f32 at these tiny sizes; for realistic sizes the conv
# and TDF weights/activations could be cast to bf16 for the MXU.


# ============================ fused Pallas kernel =============================

def _fused_kernel(*refs):
    """Whole TFC_LaSAFT forward for the full batch in one invocation.

    refs = (x0, c_rows, attn_proj, row_params, tap_masks,
            conv_w[0..NUM_LAYERS-1], w1_big, shift1, w2_big, shift2, out)
    """
    x0_ref, c_ref, proj_ref, rowp_ref, masks_ref = refs[:5]
    convw_refs = refs[5:5 + NUM_LAYERS]
    w1_ref, sh1_ref, w2_ref, sh2_ref, o_ref = refs[5 + NUM_LAYERS:]

    gb, ntf = o_ref.shape                    # (GR*B, T*F)

    # ---- TFC: densely connected 3x3 conv + BN + ReLU stack -------------------
    # Each 3x3 tap is a static lane-window of the zero-extended, lane-flattened
    # activation slab (no (8,128)-tile-crossing slice+reshape relayouts) plus a
    # per-tap frequency-edge mask; the per-batch weight sharing and the folded
    # BatchNorm scale are baked into kron(W_tap, I_B), so one
    # (G*B, C*B) x (C*B, 128) MXU dot per tap covers the whole batch.
    act = x0_ref[...]                        # (C0*B, T*F)
    y = None
    for layer in range(NUM_LAYERS):
        wl_ref = convw_refs[layer]
        cb = act.shape[0]
        zpad = jnp.zeros((cb, ntf), dtype=jnp.float32)
        act_wide = jnp.concatenate([zpad, act, zpad], axis=1)   # (cb, 3*T*F)
        acc = jnp.zeros((gb, ntf), dtype=jnp.float32)
        for i in range(KF):                  # tap offset along T
            for j in range(KT):              # tap offset along F
                tap = i * KT + j
                s = (i - KF // 2) * F_BINS + (j - KT // 2)
                win = act_wide[:, ntf + s:2 * ntf + s]          # (cb, T*F)
                if j != KT // 2:             # tap can cross a frequency edge
                    win = win * masks_ref[tap]
                acc = acc + jnp.dot(wl_ref[tap], win,
                                    preferred_element_type=jnp.float32)
        # conv bias + eval-mode BatchNorm2d folded into one per-row shift
        # (the BN scale is already folded into the weights), then ReLU.
        y = jnp.maximum(acc + rowp_ref[:, layer:layer + 1], 0.0)
        if layer + 1 < NUM_LAYERS:           # dense-net concat, stays in VMEM
            act = jnp.concatenate([y, act], axis=0)
    x_tfc = y                                # (GR*B, T*F)

    # ---- LaSAFT attention over the latent TDFs -------------------------------
    # linear_query, its bias, the key matmul and 1/sqrt(dk) are pre-composed
    # into one tiny projection; rows of c_ref are already replicated per (g, b)
    # so the softmax lands directly in the (G*B, num_tdfs) layout used below.
    qk = jnp.dot(c_ref[...], proj_ref[...], preferred_element_type=jnp.float32)
    qk = qk - jnp.max(qk, axis=-1, keepdims=True)
    e = jnp.exp(qk)
    att = e / jnp.sum(e, axis=-1, keepdims=True)                # (G*B, num_tdfs)

    # ---- TDF_f1_to_f2: two lane-dense matmuls --------------------------------
    # The per-frame Linear(F->bn) / Linear(bn->F*N) act on all T frames at once
    # through block-diagonal-over-T weights, so the token axis never needs a
    # relayout and the MXU outputs stay 64 / 512 lanes wide.
    s1 = rowp_ref[:, NUM_LAYERS:NUM_LAYERS + 1]
    s2 = rowp_ref[:, NUM_LAYERS + 1:NUM_LAYERS + 2]
    h = jnp.dot(x_tfc, w1_ref[...], preferred_element_type=jnp.float32)
    h = jnp.maximum(h * s1 + sh1_ref[...], 0.0)                 # (G*B, T*bn)
    v = jnp.dot(h, w2_ref[...], preferred_element_type=jnp.float32)
    v = jnp.maximum(v * s2 + sh2_ref[...], 0.0)                 # (G*B, N*T*F)

    # ---- attention-weighted sum over the N latent TDFs + residual ------------
    # Each term is a full-width vreg FMA ((G*B,1) sublane broadcast x a
    # vreg-aligned 128-lane block of v): no scalar extraction, no partial
    # lanes.  (A single MXU contraction over N would need a lane->sublane
    # relayout of v and costs more than these N=4 FMAs.)
    out = x_tfc
    for n in range(NUM_TDFS):
        out = out + att[:, n:n + 1] * v[:, n * ntf:(n + 1) * ntf]
    o_ref[...] = out                                            # lane-dense store


# ============================ wrapper / plumbing ==============================

def _packed_params(P, B):
    """Pre-fold / re-lay out every module parameter for the fused kernel."""
    eyeB = jnp.eye(B, dtype=jnp.float32)
    eyeT = jnp.eye(T_FRAMES, dtype=jnp.float32)

    # TFC conv layers: kron over batch, BN scale folded into the weights,
    # conv bias + BN shift folded into one per-row shift column.
    conv_ws, conv_shift_cols = [], []
    for (w, b, scale, shift) in P['tfc']:
        s_rows = jnp.repeat(scale, B)                            # (G*B,)
        taps = [jnp.kron(w[:, :, i, j], eyeB)                    # (G*B, Cin*B)
                for i in range(KF) for j in range(KT)]
        conv_ws.append(jnp.stack(taps, axis=0) * s_rows[None, :, None])
        conv_shift_cols.append(jnp.repeat(b * scale + shift, B))

    # Conv tap validity masks (the implicit zero padding of the "same" conv).
    lane = np.arange(TF_LANES)
    tt, ff = lane // F_BINS, lane % F_BINS
    mask_np = np.stack(
        [((tt + (i - KF // 2) >= 0) & (tt + (i - KF // 2) < T_FRAMES) &
          (ff + (j - KT // 2) >= 0) & (ff + (j - KT // 2) < F_BINS))
         for i in range(KF) for j in range(KT)]).astype(np.float32)
    tap_masks = jnp.asarray(mask_np).reshape(KF * KT, 1, TF_LANES)

    # Attention: linear_query (+bias), keys and 1/sqrt(dk) composed into one map.
    wq_aug = jnp.concatenate([P['wq'].T, P['bq'][None, :]], axis=0)    # (cd+1, dk)
    attn_proj = jnp.matmul(wq_aug, P['keys'], precision=HI) / DK_SQRT  # (cd+1, N)
    attn_proj = jnp.pad(attn_proj, ((0, CD_PAD), (0, 0)))

    # TDF_f1_to_f2: block-diagonal-over-T weights; the second linear's outputs
    # are permuted to (tdf, time, freq) so each latent TDF is a whole 128-lane
    # block in the kernel.
    w1_big = jnp.kron(eyeT, P['w1'].T)                                 # (T*F, T*bn)
    perm = (np.arange(F_BINS)[None, :] * NUM_TDFS +
            np.arange(NUM_TDFS)[:, None]).reshape(-1)                  # new[n*F+f]=f*N+n
    w2p = P['w2'][perm].reshape(NUM_TDFS, F_BINS, BN_UNITS)
    w2_big = jnp.concatenate(
        [jnp.kron(eyeT, w2p[n].T) for n in range(NUM_TDFS)], axis=1)   # (T*bn, N*T*F)
    b1_lane = jnp.tile(P['b1'], T_FRAMES)                              # (T*bn,)
    b2_lane = jnp.broadcast_to(
        P['b2'][perm].reshape(NUM_TDFS, 1, F_BINS),
        (NUM_TDFS, T_FRAMES, F_BINS)).reshape(-1)                      # (N*T*F,)
    s1r, t1r = jnp.repeat(P['s1'], B), jnp.repeat(P['t1'], B)
    s2r, t2r = jnp.repeat(P['s2'], B), jnp.repeat(P['t2'], B)
    shift1 = s1r[:, None] * b1_lane[None, :] + t1r[:, None]            # (G*B, T*bn)
    shift2 = s2r[:, None] * b2_lane[None, :] + t2r[:, None]            # (G*B, N*T*F)

    row_params = jnp.stack(conv_shift_cols + [s1r, s2r], axis=1)       # (G*B, NL+2)
    return (conv_ws, tap_masks, attn_proj, row_params,
            w1_big, shift1, w2_big, shift2)


def tfc_lasaft_forward(x, c, P):
    """x: (B, C, T, F) float32, c: (B, condition_dim) float32."""
    B = x.shape[0]
    gb = GR * B
    (conv_ws, tap_masks, attn_proj, row_params,
     w1_big, shift1, w2_big, shift2) = _packed_params(P, B)

    # Data-dependent inputs re-laid out for the kernel (pure layout plumbing).
    x0 = jnp.transpose(x, (1, 0, 2, 3)).reshape(IN_CHANNELS * B, TF_LANES)
    c_aug = jnp.concatenate(
        [c, jnp.ones((B, 1), jnp.float32), jnp.zeros((B, CD_PAD), jnp.float32)],
        axis=1)
    c_rows = jnp.tile(c_aug, (GR, 1))                                  # (G*B, cd+1+pad)

    inputs = ([x0, c_rows, attn_proj, row_params, tap_masks]
              + conv_ws + [w1_big, shift1, w2_big, shift2])
    vmem = pl.BlockSpec(memory_space=pltpu.MemorySpace.VMEM)
    out = pl.pallas_call(
        _fused_kernel,
        out_shape=jax.ShapeDtypeStruct((gb, TF_LANES), jnp.float32),
        in_specs=[vmem] * len(inputs),
        out_specs=vmem,
    )(*inputs)
    # back to the module's (B, C, T, F) layout
    return out.reshape(GR, B, T_FRAMES, F_BINS).transpose(1, 0, 2, 3)


# ====================== deterministic parameter init =========================

def init_params(key):
    ks = list(jax.random.split(key, 32))
    nxt = ks.pop
    p = {}
    tfc = []
    for i in range(NUM_LAYERS):
        c_in = IN_CHANNELS + i * GR
        w = 0.2 * jax.random.normal(nxt(), (GR, c_in, KF, KT), jnp.float32)
        b = 0.1 * jax.random.normal(nxt(), (GR,), jnp.float32)
        gamma = 1.0 + 0.1 * jax.random.normal(nxt(), (GR,), jnp.float32)
        beta = 0.1 * jax.random.normal(nxt(), (GR,), jnp.float32)
        mean = jnp.zeros((GR,), jnp.float32)      # BatchNorm running stats
        var = jnp.ones((GR,), jnp.float32)
        scale = gamma / jnp.sqrt(var + BN_EPS)
        shift = beta - mean * scale
        tfc.append((w, b, scale, shift))
    p['tfc'] = tfc
    # TDF_f1_to_f2(gr, f, f*num_tdfs, ...)
    p['w1'] = 0.2 * jax.random.normal(nxt(), (BN_UNITS, F_BINS), jnp.float32)
    p['b1'] = 0.1 * jax.random.normal(nxt(), (BN_UNITS,), jnp.float32)
    g1 = 1.0 + 0.1 * jax.random.normal(nxt(), (GR,), jnp.float32)
    p['s1'] = g1 / jnp.sqrt(1.0 + BN_EPS)
    p['t1'] = 0.1 * jax.random.normal(nxt(), (GR,), jnp.float32)
    p['w2'] = 0.2 * jax.random.normal(nxt(), (F_BINS * NUM_TDFS, BN_UNITS),
                                      jnp.float32)
    p['b2'] = 0.1 * jax.random.normal(nxt(), (F_BINS * NUM_TDFS,), jnp.float32)
    g2 = 1.0 + 0.1 * jax.random.normal(nxt(), (GR,), jnp.float32)
    p['s2'] = g2 / jnp.sqrt(1.0 + BN_EPS)
    p['t2'] = 0.1 * jax.random.normal(nxt(), (GR,), jnp.float32)
    # linear_query + keys
    p['wq'] = 0.3 * jax.random.normal(nxt(), (DK, CONDITION_DIM), jnp.float32)
    p['bq'] = 0.1 * jax.random.normal(nxt(), (DK,), jnp.float32)
    p['keys'] = jax.random.normal(nxt(), (DK, NUM_TDFS), jnp.float32)
    return p


# ======================= pure-JAX reference (for check) ======================

def reference_forward(x, c, P):
    def conv_layer(inp, w, b, scale, shift):
        y = lax.conv_general_dilated(
            inp, w, window_strides=(1, 1),
            padding=((KT // 2, KT // 2), (KF // 2, KF // 2)),
            dimension_numbers=('NCHW', 'OIHW', 'NCHW'), precision=HI)
        y = y + b[None, :, None, None]
        y = y * scale[None, :, None, None] + shift[None, :, None, None]
        return jnp.maximum(y, 0.0)

    x_ = conv_layer(x, *P['tfc'][0])
    xc = x
    for layer in P['tfc'][1:]:
        xc = jnp.concatenate([x_, xc], axis=1)
        x_ = conv_layer(xc, *layer)
    x_tfc = x_

    q = jnp.matmul(c, P['wq'].T, precision=HI) + P['bq']
    att = jax.nn.softmax(jnp.matmul(q, P['keys'], precision=HI) / DK_SQRT,
                         axis=-1)                                  # (B, N)

    h = jnp.matmul(x_tfc, P['w1'].T, precision=HI) + P['b1']
    h = h * P['s1'][None, :, None, None] + P['t1'][None, :, None, None]
    h = jnp.maximum(h, 0.0)
    v = jnp.matmul(h, P['w2'].T, precision=HI) + P['b2']
    v = v * P['s2'][None, :, None, None] + P['t2'][None, :, None, None]
    v = jnp.maximum(v, 0.0)
    B, G, T, F = x_tfc.shape
    v = v.reshape(B, G, T, F, NUM_TDFS)
    return x_tfc + jnp.einsum('bgtfn,bn->bgtf', v, att, precision=HI)


# ================================== main ======================================

if __name__ == "__main__":
    root = jax.random.PRNGKey(0)
    kx, kc, kp = jax.random.split(root, 3)
    x = jax.random.normal(kx, (BATCH, IN_CHANNELS, T_FRAMES, F_BINS), jnp.float32)
    c = jax.random.normal(kc, (BATCH, CONDITION_DIM), jnp.float32)
    params = init_params(kp)

    fwd = jax.jit(lambda xx, cc: tfc_lasaft_forward(xx, cc, params))
    out = jax.block_until_ready(fwd(x, c))

    ref = jax.block_until_ready(reference_forward(x, c, params))
    np.testing.assert_allclose(np.asarray(out), np.asarray(ref),
                               rtol=1e-4, atol=1e-5)
    print("KERNEL_OK")
</pallas_src>

<mosaic_0001>
module attributes {stable_mosaic.version = 11 : i64} {
  func.func @_fused_kernel(%arg0: memref<8x128xf32, #tpu.memory_space<vmem>>, %arg1: memref<8x8xf32, #tpu.memory_space<vmem>>, %arg2: memref<8x4xf32, #tpu.memory_space<vmem>>, %arg3: memref<8x4xf32, #tpu.memory_space<vmem>>, %arg4: memref<9x1x128xf32, #tpu.memory_space<vmem>>, %arg5: memref<9x8x8xf32, #tpu.memory_space<vmem>>, %arg6: memref<9x8x16xf32, #tpu.memory_space<vmem>>, %arg7: memref<128x64xf32, #tpu.memory_space<vmem>>, %arg8: memref<8x64xf32, #tpu.memory_space<vmem>>, %arg9: memref<64x512xf32, #tpu.memory_space<vmem>>, %arg10: memref<8x512xf32, #tpu.memory_space<vmem>>, %arg11: memref<8x128xf32, #tpu.memory_space<vmem>>) attributes {dimension_semantics = [], scalar_prefetch = 0 : i64, scratch_operands = 0 : i64, tpu.core_type = #tpu.core_type<tc>} {
    %c0 = arith.constant 0 : index
    %c0_0 = arith.constant 0 : index
    %0 = vector.load %arg0[%c0, %c0_0] : memref<8x128xf32, #tpu.memory_space<vmem>>, vector<8x128xf32>
    %cst = arith.constant 0.000000e+00 : f32
    %1 = vector.broadcast %cst : f32 to vector<8x128xf32>
    %2 = tpu.concatenate %1, %0, %1 in 1 : vector<8x128xf32>, vector<8x128xf32>, vector<8x128xf32> -> vector<8x384xf32>
    %cst_1 = arith.constant 0.000000e+00 : f32
    %3 = vector.broadcast %cst_1 : f32 to vector<8x128xf32>
    %4 = vector.extract_strided_slice %2 {offsets = [0, 111], sizes = [8, 128], strides = [1, 1]} : vector<8x384xf32> to vector<8x128xf32>
    %c0_2 = arith.constant 0 : index
    %c0_3 = arith.constant 0 : index
    %c0_4 = arith.constant 0 : index
    %5 = vector.load %arg4[%c0_2, %c0_3, %c0_4] : memref<9x1x128xf32, #tpu.memory_space<vmem>>, vector<1x1x128xf32>
    %6 = vector.shape_cast %5 : vector<1x1x128xf32> to vector<1x128xf32>
    %7 = vector.broadcast %6 : vector<1x128xf32> to vector<8x128xf32>
    %8 = arith.mulf %4, %7 : vector<8x128xf32>
    %c0_5 = arith.constant 0 : index
    %c0_6 = arith.constant 0 : index
    %c0_7 = arith.constant 0 : index
    %9 = vector.load %arg5[%c0_5, %c0_6, %c0_7] : memref<9x8x8xf32, #tpu.memory_space<vmem>>, vector<1x8x8xf32>
    %10 = vector.shape_cast %9 : vector<1x8x8xf32> to vector<8x8xf32>
    %cst_8 = arith.constant dense<0.000000e+00> : vector<8x128xf32>
    %11 = tpu.matmul %10, %8, %cst_8 {dimension_numbers = #tpu.dot_dimension_numbers<[1], [0], [0], [1], [0, 0, 1, 1], [], []>} : vector<8x8xf32>, vector<8x128xf32>, vector<8x128xf32> -> vector<8x128xf32>
    %12 = arith.addf %3, %11 : vector<8x128xf32>
    %13 = vector.extract_strided_slice %2 {offsets = [0, 112], sizes = [8, 128], strides = [1, 1]} : vector<8x384xf32> to vector<8x128xf32>
    %c1 = arith.constant 1 : index
    %c0_9 = arith.constant 0 : index
    %c0_10 = arith.constant 0 : index
    %14 = vector.load %arg5[%c1, %c0_9, %c0_10] : memref<9x8x8xf32, #tpu.memory_space<vmem>>, vector<1x8x8xf32>
    %15 = vector.shape_cast %14 : vector<1x8x8xf32> to vector<8x8xf32>
    %cst_11 = arith.constant dense<0.000000e+00> : vector<8x128xf32>
    %16 = tpu.matmul %15, %13, %cst_11 {dimension_numbers = #tpu.dot_dimension_numbers<[1], [0], [0], [1], [0, 0, 1, 1], [], []>} : vector<8x8xf32>, vector<8x128xf32>, vector<8x128xf32> -> vector<8x128xf32>
    %17 = arith.addf %12, %16 : vector<8x128xf32>
    %18 = vector.extract_strided_slice %2 {offsets = [0, 113], sizes = [8, 128], strides = [1, 1]} : vector<8x384xf32> to vector<8x128xf32>
    %c2 = arith.constant 2 : index
    %c0_12 = arith.constant 0 : index
    %c0_13 = arith.constant 0 : index
    %19 = vector.load %arg4[%c2, %c0_12, %c0_13] : memref<9x1x128xf32, #tpu.memory_space<vmem>>, vector<1x1x128xf32>
    %20 = vector.shape_cast %19 : vector<1x1x128xf32> to vector<1x128xf32>
    %21 = vector.broadcast %20 : vector<1x128xf32> to vector<8x128xf32>
    %22 = arith.mulf %18, %21 : vector<8x128xf32>
    %c2_14 = arith.constant 2 : index
    %c0_15 = arith.constant 0 : index
    %c0_16 = arith.constant 0 : index
    %23 = vector.load %arg5[%c2_14, %c0_15, %c0_16] : memref<9x8x8xf32, #tpu.memory_space<vmem>>, vector<1x8x8xf32>
    %24 = vector.shape_cast %23 : vector<1x8x8xf32> to vector<8x8xf32>
    %cst_17 = arith.constant dense<0.000000e+00> : vector<8x128xf32>
    %25 = tpu.matmul %24, %22, %cst_17 {dimension_numbers = #tpu.dot_dimension_numbers<[1], [0], [0], [1], [0, 0, 1, 1], [], []>} : vector<8x8xf32>, vector<8x128xf32>, vector<8x128xf32> -> vector<8x128xf32>
    %26 = arith.addf %17, %25 : vector<8x128xf32>
    %27 = vector.extract_strided_slice %2 {offsets = [0, 127], sizes = [8, 128], strides = [1, 1]} : vector<8x384xf32> to vector<8x128xf32>
    %c3 = arith.constant 3 : index
    %c0_18 = arith.constant 0 : index
    %c0_19 = arith.constant 0 : index
    %28 = vector.load %arg4[%c3, %c0_18, %c0_19] : memref<9x1x128xf32, #tpu.memory_space<vmem>>, vector<1x1x128xf32>
    %29 = vector.shape_cast %28 : vector<1x1x128xf32> to vector<1x128xf32>
    %30 = vector.broadcast %29 : vector<1x128xf32> to vector<8x128xf32>
    %31 = arith.mulf %27, %30 : vector<8x128xf32>
    %c3_20 = arith.constant 3 : index
    %c0_21 = arith.constant 0 : index
    %c0_22 = arith.constant 0 : index
    %32 = vector.load %arg5[%c3_20, %c0_21, %c0_22] : memref<9x8x8xf32, #tpu.memory_space<vmem>>, vector<1x8x8xf32>
    %33 = vector.shape_cast %32 : vector<1x8x8xf32> to vector<8x8xf32>
    %cst_23 = arith.constant dense<0.000000e+00> : vector<8x128xf32>
    %34 = tpu.matmul %33, %31, %cst_23 {dimension_numbers = #tpu.dot_dimension_numbers<[1], [0], [0], [1], [0, 0, 1, 1], [], []>} : vector<8x8xf32>, vector<8x128xf32>, vector<8x128xf32> -> vector<8x128xf32>
    %35 = arith.addf %26, %34 : vector<8x128xf32>
    %36 = vector.extract_strided_slice %2 {offsets = [0, 128], sizes = [8, 128], strides = [1, 1]} : vector<8x384xf32> to vector<8x128xf32>
    %c4 = arith.constant 4 : index
    %c0_24 = arith.constant 0 : index
    %c0_25 = arith.constant 0 : index
    %37 = vector.load %arg5[%c4, %c0_24, %c0_25] : memref<9x8x8xf32, #tpu.memory_space<vmem>>, vector<1x8x8xf32>
    %38 = vector.shape_cast %37 : vector<1x8x8xf32> to vector<8x8xf32>
    %cst_26 = arith.constant dense<0.000000e+00> : vector<8x128xf32>
    %39 = tpu.matmul %38, %36, %cst_26 {dimension_numbers = #tpu.dot_dimension_numbers<[1], [0], [0], [1], [0, 0, 1, 1], [], []>} : vector<8x8xf32>, vector<8x128xf32>, vector<8x128xf32> -> vector<8x128xf32>
    %40 = arith.addf %35, %39 : vector<8x128xf32>
    %41 = vector.extract_strided_slice %2 {offsets = [0, 129], sizes = [8, 128], strides = [1, 1]} : vector<8x384xf32> to vector<8x128xf32>
    %c5 = arith.constant 5 : index
    %c0_27 = arith.constant 0 : index
    %c0_28 = arith.constant 0 : index
    %42 = vector.load %arg4[%c5, %c0_27, %c0_28] : memref<9x1x128xf32, #tpu.memory_space<vmem>>, vector<1x1x128xf32>
    %43 = vector.shape_cast %42 : vector<1x1x128xf32> to vector<1x128xf32>
    %44 = vector.broadcast %43 : vector<1x128xf32> to vector<8x128xf32>
    %45 = arith.mulf %41, %44 : vector<8x128xf32>
    %c5_29 = arith.constant 5 : index
    %c0_30 = arith.constant 0 : index
    %c0_31 = arith.constant 0 : index
    %46 = vector.load %arg5[%c5_29, %c0_30, %c0_31] : memref<9x8x8xf32, #tpu.memory_space<vmem>>, vector<1x8x8xf32>
    %47 = vector.shape_cast %46 : vector<1x8x8xf32> to vector<8x8xf32>
    %cst_32 = arith.constant dense<0.000000e+00> : vector<8x128xf32>
    %48 = tpu.matmul %47, %45, %cst_32 {dimension_numbers = #tpu.dot_dimension_numbers<[1], [0], [0], [1], [0, 0, 1, 1], [], []>} : vector<8x8xf32>, vector<8x128xf32>, vector<8x128xf32> -> vector<8x128xf32>
    %49 = arith.addf %40, %48 : vector<8x128xf32>
    %50 = vector.extract_strided_slice %2 {offsets = [0, 143], sizes = [8, 128], strides = [1, 1]} : vector<8x384xf32> to vector<8x128xf32>
    %c6 = arith.constant 6 : index
    %c0_33 = arith.constant 0 : index
    %c0_34 = arith.constant 0 : index
    %51 = vector.load %arg4[%c6, %c0_33, %c0_34] : memref<9x1x128xf32, #tpu.memory_space<vmem>>, vector<1x1x128xf32>
    %52 = vector.shape_cast %51 : vector<1x1x128xf32> to vector<1x128xf32>
    %53 = vector.broadcast %52 : vector<1x128xf32> to vector<8x128xf32>
    %54 = arith.mulf %50, %53 : vector<8x128xf32>
    %c6_35 = arith.constant 6 : index
    %c0_36 = arith.constant 0 : index
    %c0_37 = arith.constant 0 : index
    %55 = vector.load %arg5[%c6_35, %c0_36, %c0_37] : memref<9x8x8xf32, #tpu.memory_space<vmem>>, vector<1x8x8xf32>
    %56 = vector.shape_cast %55 : vector<1x8x8xf32> to vector<8x8xf32>
    %cst_38 = arith.constant dense<0.000000e+00> : vector<8x128xf32>
    %57 = tpu.matmul %56, %54, %cst_38 {dimension_numbers = #tpu.dot_dimension_numbers<[1], [0], [0], [1], [0, 0, 1, 1], [], []>} : vector<8x8xf32>, vector<8x128xf32>, vector<8x128xf32> -> vector<8x128xf32>
    %58 = arith.addf %49, %57 : vector<8x128xf32>
    %59 = vector.extract_strided_slice %2 {offsets = [0, 144], sizes = [8, 128], strides = [1, 1]} : vector<8x384xf32> to vector<8x128xf32>
    %c7 = arith.constant 7 : index
    %c0_39 = arith.constant 0 : index
    %c0_40 = arith.constant 0 : index
    %60 = vector.load %arg5[%c7, %c0_39, %c0_40] : memref<9x8x8xf32, #tpu.memory_space<vmem>>, vector<1x8x8xf32>
    %61 = vector.shape_cast %60 : vector<1x8x8xf32> to vector<8x8xf32>
    %cst_41 = arith.constant dense<0.000000e+00> : vector<8x128xf32>
    %62 = tpu.matmul %61, %59, %cst_41 {dimension_numbers = #tpu.dot_dimension_numbers<[1], [0], [0], [1], [0, 0, 1, 1], [], []>} : vector<8x8xf32>, vector<8x128xf32>, vector<8x128xf32> -> vector<8x128xf32>
    %63 = arith.addf %58, %62 : vector<8x128xf32>
    %64 = vector.extract_strided_slice %2 {offsets = [0, 145], sizes = [8, 128], strides = [1, 1]} : vector<8x384xf32> to vector<8x128xf32>
    %c8 = arith.constant 8 : index
    %c0_42 = arith.constant 0 : index
    %c0_43 = arith.constant 0 : index
    %65 = vector.load %arg4[%c8, %c0_42, %c0_43] : memref<9x1x128xf32, #tpu.memory_space<vmem>>, vector<1x1x128xf32>
    %66 = vector.shape_cast %65 : vector<1x1x128xf32> to vector<1x128xf32>
    %67 = vector.broadcast %66 : vector<1x128xf32> to vector<8x128xf32>
    %68 = arith.mulf %64, %67 : vector<8x128xf32>
    %c8_44 = arith.constant 8 : index
    %c0_45 = arith.constant 0 : index
    %c0_46 = arith.constant 0 : index
    %69 = vector.load %arg5[%c8_44, %c0_45, %c0_46] : memref<9x8x8xf32, #tpu.memory_space<vmem>>, vector<1x8x8xf32>
    %70 = vector.shape_cast %69 : vector<1x8x8xf32> to vector<8x8xf32>
    %cst_47 = arith.constant dense<0.000000e+00> : vector<8x128xf32>
    %71 = tpu.matmul %70, %68, %cst_47 {dimension_numbers = #tpu.dot_dimension_numbers<[1], [0], [0], [1], [0, 0, 1, 1], [], []>} : vector<8x8xf32>, vector<8x128xf32>, vector<8x128xf32> -> vector<8x128xf32>
    %72 = arith.addf %63, %71 : vector<8x128xf32>
    %c0_48 = arith.constant 0 : index
    %c0_49 = arith.constant 0 : index
    %73 = vector.load %arg3[%c0_48, %c0_49] : memref<8x4xf32, #tpu.memory_space<vmem>>, vector<8x1xf32>
    %74 = vector.broadcast %73 : vector<8x1xf32> to vector<8x128xf32>
    %75 = arith.addf %72, %74 : vector<8x128xf32>
    %cst_50 = arith.constant 0.000000e+00 : f32
    %76 = vector.broadcast %cst_50 : f32 to vector<8x128xf32>
    %77 = arith.maximumf %75, %76 : vector<8x128xf32>
    %78 = tpu.concatenate %77, %0 in 0 : vector<8x128xf32>, vector<8x128xf32> -> vector<16x128xf32>
    %cst_51 = arith.constant 0.000000e+00 : f32
    %79 = vector.broadcast %cst_51 : f32 to vector<16x128xf32>
    %80 = tpu.concatenate %79, %78, %79 in 1 : vector<16x128xf32>, vector<16x128xf32>, vector<16x128xf32> -> vector<16x384xf32>
    %cst_52 = arith.constant 0.000000e+00 : f32
    %81 = vector.broadcast %cst_52 : f32 to vector<8x128xf32>
    %82 = vector.extract_strided_slice %80 {offsets = [0, 111], sizes = [16, 128], strides = [1, 1]} : vector<16x384xf32> to vector<16x128xf32>
    %c0_53 = arith.constant 0 : index
    %c0_54 = arith.constant 0 : index
    %c0_55 = arith.constant 0 : index
    %83 = vector.load %arg4[%c0_53, %c0_54, %c0_55] : memref<9x1x128xf32, #tpu.memory_space<vmem>>, vector<1x1x128xf32>
    %84 = vector.shape_cast %83 : vector<1x1x128xf32> to vector<1x128xf32>
    %85 = vector.broadcast %84 : vector<1x128xf32> to vector<16x128xf32>
    %86 = arith.mulf %82, %85 : vector<16x128xf32>
    %c0_56 = arith.constant 0 : index
    %c0_57 = arith.constant 0 : index
    %c0_58 = arith.constant 0 : index
    %87 = vector.load %arg6[%c0_56, %c0_57, %c0_58] : memref<9x8x16xf32, #tpu.memory_space<vmem>>, vector<1x8x16xf32>
    %88 = vector.shape_cast %87 : vector<1x8x16xf32> to vector<8x16xf32>
    %cst_59 = arith.constant dense<0.000000e+00> : vector<8x128xf32>
    %89 = tpu.matmul %88, %86, %cst_59 {dimension_numbers = #tpu.dot_dimension_numbers<[1], [0], [0], [1], [0, 0, 1, 1], [], []>} : vector<8x16xf32>, vector<16x128xf32>, vector<8x128xf32> -> vector<8x128xf32>
    %90 = arith.addf %81, %89 : vector<8x128xf32>
    %91 = vector.extract_strided_slice %80 {offsets = [0, 112], sizes = [16, 128], strides = [1, 1]} : vector<16x384xf32> to vector<16x128xf32>
    %c1_60 = arith.constant 1 : index
    %c0_61 = arith.constant 0 : index
    %c0_62 = arith.constant 0 : index
    %92 = vector.load %arg6[%c1_60, %c0_61, %c0_62] : memref<9x8x16xf32, #tpu.memory_space<vmem>>, vector<1x8x16xf32>
    %93 = vector.shape_cast %92 : vector<1x8x16xf32> to vector<8x16xf32>
    %cst_63 = arith.constant dense<0.000000e+00> : vector<8x128xf32>
    %94 = tpu.matmul %93, %91, %cst_63 {dimension_numbers = #tpu.dot_dimension_numbers<[1], [0], [0], [1], [0, 0, 1, 1], [], []>} : vector<8x16xf32>, vector<16x128xf32>, vector<8x128xf32> -> vector<8x128xf32>
    %95 = arith.addf %90, %94 : vector<8x128xf32>
    %96 = vector.extract_strided_slice %80 {offsets = [0, 113], sizes = [16, 128], strides = [1, 1]} : vector<16x384xf32> to vector<16x128xf32>
    %c2_64 = arith.constant 2 : index
    %c0_65 = arith.constant 0 : index
    %c0_66 = arith.constant 0 : index
    %97 = vector.load %arg4[%c2_64, %c0_65, %c0_66] : memref<9x1x128xf32, #tpu.memory_space<vmem>>, vector<1x1x128xf32>
    %98 = vector.shape_cast %97 : vector<1x1x128xf32> to vector<1x128xf32>
    %99 = vector.broadcast %98 : vector<1x128xf32> to vector<16x128xf32>
    %100 = arith.mulf %96, %99 : vector<16x128xf32>
    %c2_67 = arith.constant 2 : index
    %c0_68 = arith.constant 0 : index
    %c0_69 = arith.constant 0 : index
    %101 = vector.load %arg6[%c2_67, %c0_68, %c0_69] : memref<9x8x16xf32, #tpu.memory_space<vmem>>, vector<1x8x16xf32>
    %102 = vector.shape_cast %101 : vector<1x8x16xf32> to vector<8x16xf32>
    %cst_70 = arith.constant dense<0.000000e+00> : vector<8x128xf32>
    %103 = tpu.matmul %102, %100, %cst_70 {dimension_numbers = #tpu.dot_dimension_numbers<[1], [0], [0], [1], [0, 0, 1, 1], [], []>} : vector<8x16xf32>, vector<16x128xf32>, vector<8x128xf32> -> vector<8x128xf32>
    %104 = arith.addf %95, %103 : vector<8x128xf32>
    %105 = vector.extract_strided_slice %80 {offsets = [0, 127], sizes = [16, 128], strides = [1, 1]} : vector<16x384xf32> to vector<16x128xf32>
    %c3_71 = arith.constant 3 : index
    %c0_72 = arith.constant 0 : index
    %c0_73 = arith.constant 0 : index
    %106 = vector.load %arg4[%c3_71, %c0_72, %c0_73] : memref<9x1x128xf32, #tpu.memory_space<vmem>>, vector<1x1x128xf32>
    %107 = vector.shape_cast %106 : vector<1x1x128xf32> to vector<1x128xf32>
    %108 = vector.broadcast %107 : vector<1x128xf32> to vector<16x128xf32>
    %109 = arith.mulf %105, %108 : vector<16x128xf32>
    %c3_74 = arith.constant 3 : index
    %c0_75 = arith.constant 0 : index
    %c0_76 = arith.constant 0 : index
    %110 = vector.load %arg6[%c3_74, %c0_75, %c0_76] : memref<9x8x16xf32, #tpu.memory_space<vmem>>, vector<1x8x16xf32>
    %111 = vector.shape_cast %110 : vector<1x8x16xf32> to vector<8x16xf32>
    %cst_77 = arith.constant dense<0.000000e+00> : vector<8x128xf32>
    %112 = tpu.matmul %111, %109, %cst_77 {dimension_numbers = #tpu.dot_dimension_numbers<[1], [0], [0], [1], [0, 0, 1, 1], [], []>} : vector<8x16xf32>, vector<16x128xf32>, vector<8x128xf32> -> vector<8x128xf32>
    %113 = arith.addf %104, %112 : vector<8x128xf32>
    %114 = vector.extract_strided_slice %80 {offsets = [0, 128], sizes = [16, 128], strides = [1, 1]} : vector<16x384xf32> to vector<16x128xf32>
    %c4_78 = arith.constant 4 : index
    %c0_79 = arith.constant 0 : index
    %c0_80 = arith.constant 0 : index
    %115 = vector.load %arg6[%c4_78, %c0_79, %c0_80] : memref<9x8x16xf32, #tpu.memory_space<vmem>>, vector<1x8x16xf32>
    %116 = vector.shape_cast %115 : vector<1x8x16xf32> to vector<8x16xf32>
    %cst_81 = arith.constant dense<0.000000e+00> : vector<8x128xf32>
    %117 = tpu.matmul %116, %114, %cst_81 {dimension_numbers = #tpu.dot_dimension_numbers<[1], [0], [0], [1], [0, 0, 1, 1], [], []>} : vector<8x16xf32>, vector<16x128xf32>, vector<8x128xf32> -> vector<8x128xf32>
    %118 = arith.addf %113, %117 : vector<8x128xf32>
    %119 = vector.extract_strided_slice %80 {offsets = [0, 129], sizes = [16, 128], strides = [1, 1]} : vector<16x384xf32> to vector<16x128xf32>
    %c5_82 = arith.constant 5 : index
    %c0_83 = arith.constant 0 : index
    %c0_84 = arith.constant 0 : index
    %120 = vector.load %arg4[%c5_82, %c0_83, %c0_84] : memref<9x1x128xf32, #tpu.memory_space<vmem>>, vector<1x1x128xf32>
    %121 = vector.shape_cast %120 : vector<1x1x128xf32> to vector<1x128xf32>
    %122 = vector.broadcast %121 : vector<1x128xf32> to vector<16x128xf32>
    %123 = arith.mulf %119, %122 : vector<16x128xf32>
    %c5_85 = arith.constant 5 : index
    %c0_86 = arith.constant 0 : index
    %c0_87 = arith.constant 0 : index
    %124 = vector.load %arg6[%c5_85, %c0_86, %c0_87] : memref<9x8x16xf32, #tpu.memory_space<vmem>>, vector<1x8x16xf32>
    %125 = vector.shape_cast %124 : vector<1x8x16xf32> to vector<8x16xf32>
    %cst_88 = arith.constant dense<0.000000e+00> : vector<8x128xf32>
    %126 = tpu.matmul %125, %123, %cst_88 {dimension_numbers = #tpu.dot_dimension_numbers<[1], [0], [0], [1], [0, 0, 1, 1], [], []>} : vector<8x16xf32>, vector<16x128xf32>, vector<8x128xf32> -> vector<8x128xf32>
    %127 = arith.addf %118, %126 : vector<8x128xf32>
    %128 = vector.extract_strided_slice %80 {offsets = [0, 143], sizes = [16, 128], strides = [1, 1]} : vector<16x384xf32> to vector<16x128xf32>
    %c6_89 = arith.constant 6 : index
    %c0_90 = arith.constant 0 : index
    %c0_91 = arith.constant 0 : index
    %129 = vector.load %arg4[%c6_89, %c0_90, %c0_91] : memref<9x1x128xf32, #tpu.memory_space<vmem>>, vector<1x1x128xf32>
    %130 = vector.shape_cast %129 : vector<1x1x128xf32> to vector<1x128xf32>
    %131 = vector.broadcast %130 : vector<1x128xf32> to vector<16x128xf32>
    %132 = arith.mulf %128, %131 : vector<16x128xf32>
    %c6_92 = arith.constant 6 : index
    %c0_93 = arith.constant 0 : index
    %c0_94 = arith.constant 0 : index
    %133 = vector.load %arg6[%c6_92, %c0_93, %c0_94] : memref<9x8x16xf32, #tpu.memory_space<vmem>>, vector<1x8x16xf32>
    %134 = vector.shape_cast %133 : vector<1x8x16xf32> to vector<8x16xf32>
    %cst_95 = arith.constant dense<0.000000e+00> : vector<8x128xf32>
    %135 = tpu.matmul %134, %132, %cst_95 {dimension_numbers = #tpu.dot_dimension_numbers<[1], [0], [0], [1], [0, 0, 1, 1], [], []>} : vector<8x16xf32>, vector<16x128xf32>, vector<8x128xf32> -> vector<8x128xf32>
    %136 = arith.addf %127, %135 : vector<8x128xf32>
    %137 = vector.extract_strided_slice %80 {offsets = [0, 144], sizes = [16, 128], strides = [1, 1]} : vector<16x384xf32> to vector<16x128xf32>
    %c7_96 = arith.constant 7 : index
    %c0_97 = arith.constant 0 : index
    %c0_98 = arith.constant 0 : index
    %138 = vector.load %arg6[%c7_96, %c0_97, %c0_98] : memref<9x8x16xf32, #tpu.memory_space<vmem>>, vector<1x8x16xf32>
    %139 = vector.shape_cast %138 : vector<1x8x16xf32> to vector<8x16xf32>
    %cst_99 = arith.constant dense<0.000000e+00> : vector<8x128xf32>
    %140 = tpu.matmul %139, %137, %cst_99 {dimension_numbers = #tpu.dot_dimension_numbers<[1], [0], [0], [1], [0, 0, 1, 1], [], []>} : vector<8x16xf32>, vector<16x128xf32>, vector<8x128xf32> -> vector<8x128xf32>
    %141 = arith.addf %136, %140 : vector<8x128xf32>
    %142 = vector.extract_strided_slice %80 {offsets = [0, 145], sizes = [16, 128], strides = [1, 1]} : vector<16x384xf32> to vector<16x128xf32>
    %c8_100 = arith.constant 8 : index
    %c0_101 = arith.constant 0 : index
    %c0_102 = arith.constant 0 : index
    %143 = vector.load %arg4[%c8_100, %c0_101, %c0_102] : memref<9x1x128xf32, #tpu.memory_space<vmem>>, vector<1x1x128xf32>
    %144 = vector.shape_cast %143 : vector<1x1x128xf32> to vector<1x128xf32>
    %145 = vector.broadcast %144 : vector<1x128xf32> to vector<16x128xf32>
    %146 = arith.mulf %142, %145 : vector<16x128xf32>
    %c8_103 = arith.constant 8 : index
    %c0_104 = arith.constant 0 : index
    %c0_105 = arith.constant 0 : index
    %147 = vector.load %arg6[%c8_103, %c0_104, %c0_105] : memref<9x8x16xf32, #tpu.memory_space<vmem>>, vector<1x8x16xf32>
    %148 = vector.shape_cast %147 : vector<1x8x16xf32> to vector<8x16xf32>
    %cst_106 = arith.constant dense<0.000000e+00> : vector<8x128xf32>
    %149 = tpu.matmul %148, %146, %cst_106 {dimension_numbers = #tpu.dot_dimension_numbers<[1], [0], [0], [1], [0, 0, 1, 1], [], []>} : vector<8x16xf32>, vector<16x128xf32>, vector<8x128xf32> -> vector<8x128xf32>
    %150 = arith.addf %141, %149 : vector<8x128xf32>
    %c0_107 = arith.constant 0 : index
    %c1_108 = arith.constant 1 : index
    %151 = vector.load %arg3[%c0_107, %c1_108] : memref<8x4xf32, #tpu.memory_space<vmem>>, vector<8x1xf32>
    %152 = vector.broadcast %151 : vector<8x1xf32> to vector<8x128xf32>
    %153 = arith.addf %150, %152 : vector<8x128xf32>
    %cst_109 = arith.constant 0.000000e+00 : f32
    %154 = vector.broadcast %cst_109 : f32 to vector<8x128xf32>
    %155 = arith.maximumf %153, %154 : vector<8x128xf32>
    %c0_110 = arith.constant 0 : index
    %c0_111 = arith.constant 0 : index
    %156 = vector.load %arg1[%c0_110, %c0_111] : memref<8x8xf32, #tpu.memory_space<vmem>>, vector<8x8xf32>
    %c0_112 = arith.constant 0 : index
    %c0_113 = arith.constant 0 : index
    %157 = vector.load %arg2[%c0_112, %c0_113] : memref<8x4xf32, #tpu.memory_space<vmem>>, vector<8x4xf32>
    %cst_114 = arith.constant dense<0.000000e+00> : vector<8x4xf32>
    %158 = tpu.matmul %156, %157, %cst_114 {dimension_numbers = #tpu.dot_dimension_numbers<[1], [0], [0], [1], [0, 0, 1, 1], [], []>} : vector<8x8xf32>, vector<8x4xf32>, vector<8x4xf32> -> vector<8x4xf32>
    %cst_115 = arith.constant dense<0xFF800000> : vector<8xf32>
    %159 = vector.multi_reduction <maximumf>, %158, %cst_115 [1] : vector<8x4xf32> to vector<8xf32>
    %160 = vector.shape_cast %159 : vector<8xf32> to vector<8x1xf32>
    %161 = vector.broadcast %160 : vector<8x1xf32> to vector<8x4xf32>
    %162 = arith.subf %158, %161 : vector<8x4xf32>
    %163 = math.exp %162 : vector<8x4xf32>
    %cst_116 = arith.constant dense<0.000000e+00> : vector<8xf32>
    %164 = vector.multi_reduction <add>, %163, %cst_116 [1] : vector<8x4xf32> to vector<8xf32>
    %165 = vector.shape_cast %164 : vector<8xf32> to vector<8x1xf32>
    %166 = vector.broadcast %165 : vector<8x1xf32> to vector<8x4xf32>
    %167 = arith.divf %163, %166 : vector<8x4xf32>
    %c0_117 = arith.constant 0 : index
    %c2_118 = arith.constant 2 : index
    %168 = vector.load %arg3[%c0_117, %c2_118] : memref<8x4xf32, #tpu.memory_space<vmem>>, vector<8x1xf32>
    %c0_119 = arith.constant 0 : index
    %c3_120 = arith.constant 3 : index
    %169 = vector.load %arg3[%c0_119, %c3_120] : memref<8x4xf32, #tpu.memory_space<vmem>>, vector<8x1xf32>
    %c0_121 = arith.constant 0 : index
    %c0_122 = arith.constant 0 : index
    %170 = vector.load %arg7[%c0_121, %c0_122] : memref<128x64xf32, #tpu.memory_space<vmem>>, vector<128x64xf32>
    %cst_123 = arith.constant dense<0.000000e+00> : vector<8x64xf32>
    %171 = tpu.matmul %155, %170, %cst_123 {dimension_numbers = #tpu.dot_dimension_numbers<[1], [0], [0], [1], [0, 0, 1, 1], [], []>} : vector<8x128xf32>, vector<128x64xf32>, vector<8x64xf32> -> vector<8x64xf32>
    %172 = vector.broadcast %168 : vector<8x1xf32> to vector<8x64xf32>
    %173 = arith.mulf %171, %172 : vector<8x64xf32>
    %c0_124 = arith.constant 0 : index
    %c0_125 = arith.constant 0 : index
    %174 = vector.load %arg8[%c0_124, %c0_125] : memref<8x64xf32, #tpu.memory_space<vmem>>, vector<8x64xf32>
    %175 = arith.addf %173, %174 : vector<8x64xf32>
    %cst_126 = arith.constant 0.000000e+00 : f32
    %176 = vector.broadcast %cst_126 : f32 to vector<8x64xf32>
    %177 = arith.maximumf %175, %176 : vector<8x64xf32>
    %c0_127 = arith.constant 0 : index
    %c0_128 = arith.constant 0 : index
    %178 = vector.load %arg9[%c0_127, %c0_128] : memref<64x512xf32, #tpu.memory_space<vmem>>, vector<64x512xf32>
    %cst_129 = arith.constant dense<0.000000e+00> : vector<8x512xf32>
    %179 = tpu.matmul %177, %178, %cst_129 {dimension_numbers = #tpu.dot_dimension_numbers<[1], [0], [0], [1], [0, 0, 1, 1], [], []>} : vector<8x64xf32>, vector<64x512xf32>, vector<8x512xf32> -> vector<8x512xf32>
    %180 = vector.broadcast %169 : vector<8x1xf32> to vector<8x512xf32>
    %181 = arith.mulf %179, %180 : vector<8x512xf32>
    %c0_130 = arith.constant 0 : index
    %c0_131 = arith.constant 0 : index
    %182 = vector.load %arg10[%c0_130, %c0_131] : memref<8x512xf32, #tpu.memory_space<vmem>>, vector<8x512xf32>
    %183 = arith.addf %181, %182 : vector<8x512xf32>
    %cst_132 = arith.constant 0.000000e+00 : f32
    %184 = vector.broadcast %cst_132 : f32 to vector<8x512xf32>
    %185 = arith.maximumf %183, %184 : vector<8x512xf32>
    %186 = vector.extract_strided_slice %167 {offsets = [0, 0], sizes = [8, 1], strides = [1, 1]} : vector<8x4xf32> to vector<8x1xf32>
    %187 = vector.extract_strided_slice %185 {offsets = [0, 0], sizes = [8, 128], strides = [1, 1]} : vector<8x512xf32> to vector<8x128xf32>
    %188 = vector.broadcast %186 : vector<8x1xf32> to vector<8x128xf32>
    %189 = arith.mulf %188, %187 : vector<8x128xf32>
    %190 = arith.addf %155, %189 : vector<8x128xf32>
    %191 = vector.extract_strided_slice %167 {offsets = [0, 1], sizes = [8, 1], strides = [1, 1]} : vector<8x4xf32> to vector<8x1xf32>
    %192 = vector.extract_strided_slice %185 {offsets = [0, 128], sizes = [8, 128], strides = [1, 1]} : vector<8x512xf32> to vector<8x128xf32>
    %193 = vector.broadcast %191 : vector<8x1xf32> to vector<8x128xf32>
    %194 = arith.mulf %193, %192 : vector<8x128xf32>
    %195 = arith.addf %190, %194 : vector<8x128xf32>
    %196 = vector.extract_strided_slice %167 {offsets = [0, 2], sizes = [8, 1], strides = [1, 1]} : vector<8x4xf32> to vector<8x1xf32>
    %197 = vector.extract_strided_slice %185 {offsets = [0, 256], sizes = [8, 128], strides = [1, 1]} : vector<8x512xf32> to vector<8x128xf32>
    %198 = vector.broadcast %196 : vector<8x1xf32> to vector<8x128xf32>
    %199 = arith.mulf %198, %197 : vector<8x128xf32>
    %200 = arith.addf %195, %199 : vector<8x128xf32>
    %201 = vector.extract_strided_slice %167 {offsets = [0, 3], sizes = [8, 1], strides = [1, 1]} : vector<8x4xf32> to vector<8x1xf32>
    %202 = vector.extract_strided_slice %185 {offsets = [0, 384], sizes = [8, 128], strides = [1, 1]} : vector<8x512xf32> to vector<8x128xf32>
    %203 = vector.broadcast %201 : vector<8x1xf32> to vector<8x128xf32>
    %204 = arith.mulf %203, %202 : vector<8x128xf32>
    %205 = arith.addf %200, %204 : vector<8x128xf32>
    %c0_133 = arith.constant 0 : index
    %c0_134 = arith.constant 0 : index
    %206 = vector.load %arg11[%c0_133, %c0_134] : memref<8x128xf32, #tpu.memory_space<vmem>>, vector<8x128xf32>
    tpu.vector_store %arg11[%c0_133, %c0_134], %205 {strides = array<i32>} : memref<8x128xf32, #tpu.memory_space<vmem>>, vector<8x128xf32>,
    return
  }
}

</mosaic_0001>

<bundles_post_ra>
// kernel: mul.83
= control target key start
LH: loop header
LB: loop body
LE: loop exit
PB: predicated region body
PF: predicated region fallthrough
CT: control target
= control target key end

     0   :  { %vm8_vm0 = vcmask 15360   ;;  %s40_s8 = smov 2   ;;  %s41_s9 = smov 4   ;;  %vm14_vm1 = vcmask 64560   ;;  %vm20_vm2 = vcmask 48160   ;;  %vm26_vm3 = vcmask 31760   ;;  %s58_s0 = inlined_call_operand.vmem [shape: f32[4,2], index: 0, kind: input, shape index: {}]   ;;  %s59_s1 = inlined_call_operand.vmem [shape: f32[8], index: 1, kind: output, shape index: {}]  }
   0x1   :  { %v5_v0 = vld [vmem:[%s58_s0] sm:$0xf]  ;;  %s39_s0 = smov 6  }
   0x2   :  { %6 = vst [vmem:[#allocation1] sm:$0xf] %v5_v0 }
   0x9   :  { %v11_v1 = vld [vmem:[#allocation1 + $0x3] sm:$0x1]   ;;  %v23_v2 = vld [vmem:[#allocation1 + $0x1] sm:$0x1]   ;;  %v7_v3 = vld [vmem:[#allocation1] sm:$0x1]  }
   0xa   :  { %12 = vrot.lane.b32.xlu0 %v11_v1, %s39_s0  ;;  %24 = vrot.lane.b32.xlu1 %v23_v2, %s40_s8  ;;  %v17_v4 = vld [vmem:[#allocation1 + $0x2] sm:$0x1]   ;;  %9 = vst.msk [vmem:[#allocation0] sm:$0x1] %vm8_vm0, %v7_v3  }
   0xe   :  { %18 = vrot.lane.b32.xlu0 %v17_v4, %s41_s9 }
  0x7c   :  { %v13_v5 = vpop.permute.xlu0 %12   ;;  %v25_v6 = vpop.permute.xlu1 %24  }
  0x7d   :  { %15 = vst.msk [vmem:[#allocation0] sm:$0x1] %vm14_vm1, %v13_v5  }
  0x80   :  { %v19_v7 = vpop.permute.xlu0 %18  }
  0x81   :  { %21 = vst.msk [vmem:[#allocation0] sm:$0x1] %vm20_vm2, %v19_v7  }
  0x82   :  { %27 = vst.msk [vmem:[#allocation0] sm:$0x1] %vm26_vm3, %v25_v6  }
  0x89   :  { %v32_v8 = vld [vmem:[#allocation0] sm:$0x1] }
  0x8a   :  { %35 = vst [vmem:[%s59_s1] sm:$0x1] %v32_v8 }

// kernel: mul.97
= control target key start
LH: loop header
LB: loop body
LE: loop exit
PB: predicated region body
PF: predicated region fallthrough
CT: control target
= control target key end

     0   :  { %s69_s8 = smov 112   ;;  %s70_s11 = smov 80   ;;  %vm3_vm0 = vcmask 130048   ;;  %vm9_vm1 = vcmask 1048448   ;;  %vm15_vm2 = vcmask 917248   ;;  %vm21_vm3 = vcmask 786048   ;;  %s113_s0 = inlined_call_operand.vmem [shape: f32[4,8,16], index: 0, kind: input, shape index: {}]   ;;  %s114_s1 = inlined_call_operand.vmem [shape: f32[512], index: 1, kind: output, shape index: {}]  }
   0x1   :  { %v55_v0 = vld [vmem:[%s113_s0 + $0x7] ss:$8 sm:$0xf]   ;;  %v57_v1 = vld [vmem:[%s113_s0 + $0x5] ss:$8 sm:$0xf]  }
   0x2   :  { %7 = vrot.lane.b32.xlu0 %v55_v0, %s69_s8  ;;  %19 = vrot.lane.b32.xlu1 %v57_v1, %s70_s11  ;;  %v56_v2 = vld [vmem:[%s113_s0 + $0x6] ss:$8 sm:$0xf]   ;;  %v58_v3 = vld [vmem:[%s113_s0 + $0x4] ss:$8 sm:$0xf]  }
   0x3   :  { %s71_s16 = smov 96   ;;  %v2_v4 = vld [vmem:[%s113_s0] ss:$8 sm:$0xf]   ;;  %s72_s19 = smov 64   ;;  %vm27_vm4 = vcmask 654848  }
   0x4   :  { %v59_v5 = vld [vmem:[%s113_s0 + $0x3] ss:$8 sm:$0xf]   ;;  %4 = vst.msk [vmem:[#allocation0] sm:$0xf] %vm3_vm0, %v2_v4   ;;  %s73_s24 = smov 48  }
   0x5   :  { %v60_v6 = vld [vmem:[%s113_s0 + $0x2] ss:$8 sm:$0xf]   ;;  %s74_s25 = smov 32   ;;  %vm33_vm5 = vcmask 523648   ;;  %vm39_vm6 = vcmask 392448  }
   0x6   :  { %13 = vrot.lane.b32.xlu0 %v56_v2, %s71_s16  ;;  %25 = vrot.lane.b32.xlu1 %v58_v3, %s72_s19  ;;  %v61_v7 = vld [vmem:[%s113_s0 + $0x1] ss:$8 sm:$0xf]   ;;  %s75_s0 = smov 16   ;;  %vm45_vm7 = vcmask 261248  }
   0xa   :  { %31 = vrot.lane.b32.xlu0 %v59_v5, %s73_s24  ;;  %37 = vrot.lane.b32.xlu1 %v60_v6, %s74_s25 }
   0xe   :  { %43 = vrot.lane.b32.xlu0 %v61_v7, %s75_s0 }
  0x74   :  { %v8_v8 = vpop.permute.xlu0 %7   ;;  %v20_v9 = vpop.permute.xlu1 %19  }
  0x75   :  { %10 = vst.msk [vmem:[#allocation0] sm:$0xf] %vm9_vm1, %v8_v8  }
  0x78   :  { %v14_v10 = vpop.permute.xlu0 %13   ;;  %v26_v11 = vpop.permute.xlu1 %25  }
  0x79   :  { %16 = vst.msk [vmem:[#allocation0] sm:$0xf] %vm15_vm2, %v14_v10  }
  0x7a   :  { %22 = vst.msk [vmem:[#allocation0] sm:$0xf] %vm21_vm3, %v20_v9  }
  0x7b   :  { %28 = vst.msk [vmem:[#allocation0] sm:$0xf] %vm27_vm4, %v26_v11  }
  0x7c   :  { %v32_v12 = vpop.permute.xlu0 %31   ;;  %v38_v13 = vpop.permute.xlu1 %37  }
  0x7d   :  { %34 = vst.msk [vmem:[#allocation0] sm:$0xf] %vm33_vm5, %v32_v12  }
  0x7e   :  { %40 = vst.msk [vmem:[#allocation0] sm:$0xf] %vm39_vm6, %v38_v13  }
  0x80   :  { %v44_v14 = vpop.permute.xlu0 %43  }
  0x81   :  { %46 = vst.msk [vmem:[#allocation0] sm:$0xf] %vm45_vm7, %v44_v14  }
  0x88   :  { %v51_v15 = vld [vmem:[#allocation0] sm:$0xf] }
  0x89   :  { %54 = vst [vmem:[%s114_s1] sm:$0xf] %v51_v15 }

// kernel: tile.11
= control target key start
LH: loop header
LB: loop body
LE: loop exit
PB: predicated region body
PF: predicated region fallthrough
CT: control target
= control target key end

     0   :  { %s22_s0 = inlined_call_operand.vmem [shape: f32[8], index: 0, kind: input, shape index: {}]   ;;  %s23_s1 = inlined_call_operand.vmem [shape: f32[8,8], index: 1, kind: output, shape index: {}]  }
   0x1   :  { %v4_v0 = vld [vmem:[%s22_s0] ss:$0 sm:$0xff] }
   0x2   :  { %5 = vst [vmem:[%s23_s1] sm:$0xff] %v4_v0 }

// kernel: mul.90
= control target key start
LH: loop header
LB: loop body
LE: loop exit
PB: predicated region body
PF: predicated region fallthrough
CT: control target
= control target key end

     0   :  { %s69_s10 = smov 56   ;;  %s70_s11 = smov 40   ;;  %vm3_vm0 = vcmask 64512   ;;  %vm9_vm1 = vcmask 523712   ;;  %vm15_vm2 = vcmask 458112   ;;  %vm21_vm3 = vcmask 392512   ;;  %s113_s0 = inlined_call_operand.vmem [shape: f32[8,8], index: 0, kind: input, shape index: {}]   ;;  %s114_s1 = inlined_call_operand.vmem [shape: f32[64], index: 1, kind: output, shape index: {}]  }
   0x1   :  { %v55_v0 = vld [vmem:[%s113_s0 + $0x7] sm:$0x1]   ;;  %v57_v1 = vld [vmem:[%s113_s0 + $0x5] sm:$0x1]   ;;  %v56_v2 = vld [vmem:[%s113_s0 + $0x6] sm:$0x1]  }
   0x2   :  { %7 = vrot.lane.b32.xlu0 %v55_v0, %s69_s10  ;;  %19 = vrot.lane.b32.xlu1 %v57_v1, %s70_s11  ;;  %v58_v3 = vld [vmem:[%s113_s0 + $0x4] sm:$0x1]   ;;  %v2_v4 = vld [vmem:[%s113_s0] sm:$0x1]   ;;  %s71_s18 = smov 48   ;;  %s72_s19 = smov 32  }
   0x3   :  { %4 = vst.msk [vmem:[#allocation0] sm:$0x1] %vm3_vm0, %v2_v4   ;;  %v59_v5 = vld [vmem:[%s113_s0 + $0x3] sm:$0x1]   ;;  %v60_v6 = vld [vmem:[%s113_s0 + $0x2] sm:$0x1]  }
   0x4   :  { %s73_s24 = smov 24   ;;  %s74_s25 = smov 16   ;;  %v61_v7 = vld [vmem:[%s113_s0 + $0x1] sm:$0x1]   ;;  %vm27_vm4 = vcmask 326912   ;;  %vm33_vm5 = vcmask 261312  }
   0x5   :  { %s75_s0 = smov 8   ;;  %vm39_vm6 = vcmask 195712   ;;  %vm45_vm7 = vcmask 130112  }
   0x6   :  { %13 = vrot.lane.b32.xlu0 %v56_v2, %s71_s18  ;;  %25 = vrot.lane.b32.xlu1 %v58_v3, %s72_s19 }
   0xa   :  { %31 = vrot.lane.b32.xlu0 %v59_v5, %s73_s24  ;;  %37 = vrot.lane.b32.xlu1 %v60_v6, %s74_s25 }
   0xe   :  { %43 = vrot.lane.b32.xlu0 %v61_v7, %s75_s0 }
  0x74   :  { %v8_v8 = vpop.permute.xlu0 %7   ;;  %v20_v9 = vpop.permute.xlu1 %19  }
  0x75   :  { %10 = vst.msk [vmem:[#allocation0] sm:$0x1] %vm9_vm1, %v8_v8  }
  0x78   :  { %v14_v10 = vpop.permute.xlu0 %13   ;;  %v26_v11 = vpop.permute.xlu1 %25  }
  0x79   :  { %16 = vst.msk [vmem:[#allocation0] sm:$0x1] %vm15_vm2, %v14_v10  }
  0x7a   :  { %22 = vst.msk [vmem:[#allocation0] sm:$0x1] %vm21_vm3, %v20_v9  }
  0x7b   :  { %28 = vst.msk [vmem:[#allocation0] sm:$0x1] %vm27_vm4, %v26_v11  }
  0x7c   :  { %v32_v12 = vpop.permute.xlu0 %31   ;;  %v38_v13 = vpop.permute.xlu1 %37  }
  0x7d   :  { %34 = vst.msk [vmem:[#allocation0] sm:$0x1] %vm33_vm5, %v32_v12  }
  0x7e   :  { %40 = vst.msk [vmem:[#allocation0] sm:$0x1] %vm39_vm6, %v38_v13  }
  0x80   :  { %v44_v14 = vpop.permute.xlu0 %43  }
  0x81   :  { %46 = vst.msk [vmem:[#allocation0] sm:$0x1] %vm45_vm7, %v44_v14  }
  0x88   :  { %v51_v15 = vld [vmem:[#allocation0] sm:$0x1] }
  0x89   :  { %54 = vst [vmem:[%s114_s1] sm:$0x1] %v51_v15 }

// kernel: _lambda_.1
= control target key start
LH: loop header
LB: loop body
LE: loop exit
PB: predicated region body
PF: predicated region fallthrough
CT: control target
= control target key end

     0   :  { %v2297_v2 = vmov 0.0   ;;  %s2298_s21 = smov 111   ;;  %s2299_s24 = smov 127   ;;  %vm2306_vm0 = vmmov 0   ;;  %vm59_vm1 = vcmask 130048   ;;  %vm62_vm2 = vcmask 64512   ;;  %s2895_s4 = inlined_call_operand.vmem [shape: f32[9,1,128], index: 4, kind: input, shape index: {}]   ;;  %s2896_s0 = inlined_call_operand.vmem [shape: f32[8,128], index: 0, kind: input, shape index: {}]   ;;  %s2897_s5 = inlined_call_operand.vmem [shape: f32[9,8,8], index: 5, kind: input, shape index: {}]   ;;  %s2898_s3 = inlined_call_operand.vmem [shape: f32[8,4], index: 3, kind: input, shape index: {}]   ;;  %s2899_s6 = inlined_call_operand.vmem [shape: f32[9,8,16], index: 6, kind: input, shape index: {}]   ;;  %s2900_s2 = inlined_call_operand.vmem [shape: f32[8,4], index: 2, kind: input, shape index: {}]   ;;  %s2901_s1 = inlined_call_operand.vmem [shape: f32[8,8], index: 1, kind: input, shape index: {}]   ;;  %s2902_s7 = inlined_call_operand.vmem [shape: f32[128,64], index: 7, kind: input, shape index: {}]   ;;  %s2903_s9 = inlined_call_operand.vmem [shape: f32[64,512], index: 9, kind: input, shape index: {}]   ;;  %s2904_s8 = inlined_call_operand.vmem [shape: f32[8,64], index: 8, kind: input, shape index: {}]   ;;  %s2905_s10 = inlined_call_operand.vmem [shape: f32[8,512], index: 10, kind: input, shape index: {}]   ;;  %s2906_s11 = inlined_call_operand.vmem [shape: f32[8,128], index: 11, kind: output, shape index: {}]  }
   0x1   :  { %v2011_v0 = vld [vmem:[%s2895_s4] ss:$0 sm:$0xff]  ;;  %v2020_v1 = vld [vmem:[%s2895_s4 + $0x3] ss:$0 sm:$0xff]  ;;  %2123 = vmatprep.subr.mxu0 %v2297_v2  ;;  %2128 = vmatprep.subr.mxu1 %v2297_v2  ;;  %v2016_v3 = vld [vmem:[%s2895_s4 + $0x2] ss:$0 sm:$0xff] }
   0x2   :  { %45 = vrot.lane.b32.xlu0 %v2011_v0, %s2298_s21  ;;  %322 = vrot.lane.b32.xlu1 %v2020_v1, %s2299_s24  ;;  %v2026_v4 = vld [vmem:[%s2895_s4 + $0x5] ss:$0 sm:$0xff]  ;;  %s2300_s27 = smov 113   ;;  %s2301_s28 = smov 1   ;;  %v2030_v5 = vld [vmem:[%s2895_s4 + $0x6] ss:$0 sm:$0xff] }
   0x3   :  { %v2036_v6 = vld [vmem:[%s2895_s4 + $0x8] ss:$0 sm:$0xff]  ;;  %s2302_s14 = smov 15   ;;  %s2303_s15 = smov 17   ;;  %v2400_v7 = vld [vmem:[%s2896_s0] sm:$0xff]  ;;  %2125 = vmatprep.mubr.msk.f32.mxu0 %vm2306_vm0, %v2297_v2  ;;  %2130 = vmatprep.mubr.msk.f32.mxu1 %vm2306_vm0, %v2297_v2  ;;  %v2307_v26 = vmov 0  }
   0x4   :  { %s2304_s18 = smov 16   ;;  %s2305_s19 = smov 112   ;;  %v2012_v25 = vld [vmem:[%s2897_s5 + $0x8] sm:$0xff]  ;;  %2285 = vset.pattern.permute.xlu0 %v2307_v26  ;;  %v2474_v31 = vld [vmem:[%s2898_s3] sm:$0xff]  ;;  %vm142_vm3 = vcmask 138240   ;;  %vm238_vm4 = vcmask 121856  }
   0x5   :  { %v50_v36 = vld [vmem:[%s2897_s5] sm:$0xff]  ;;  %v2017_v40 = vld [vmem:[%s2897_s5 + $0x10] sm:$0xff]  ;;  %vm335_vm5 = vcmask 7168   ;;  %v2021_v44 = vld [vmem:[%s2897_s5 + $0x18] sm:$0xff]  ;;  %vm508_vm6 = vcmask 1039360   ;;  %vm688_vm7 = vcmask 916480  }
   0x6   :  { %225 = vrot.lane.b32.xlu0 %v2016_v3, %s2300_s27  ;;  %495 = vrot.lane.b32.xlu1 %v2026_v4, %s2301_s28  ;;  %v2023_v46 = vld [vmem:[%s2897_s5 + $0x20] sm:$0xff]  ;;  %v2027_v49 = vld [vmem:[%s2897_s5 + $0x28] sm:$0xff]  ;;  %vm605_vm8 = vcmask 924672   ;;  %vm785_vm9 = vcmask 908288   ;;  %vm1677_vm10 = vcmask 31744   ;;  %vm1815_vm11 = vcmask 523264  }
   0x7   :  { %v2031_v54 = vld [vmem:[%s2897_s5 + $0x30] sm:$0xff]  ;;  %v2033_v55 = vld [vmem:[%s2897_s5 + $0x38] sm:$0xff]  ;;  %v2037_v59 = vld [vmem:[%s2897_s5 + $0x40] sm:$0xff] }
   0xa   :  { %592 = vrot.lane.b32.xlu0 %v2030_v5, %s2302_s14  ;;  %772 = vrot.lane.b32.xlu1 %v2036_v6, %s2303_s15 }
   0xe   :  { %55 = vrot.lane.b32.xlu0 %v2297_v2, %s2304_s18  ;;  %57 = vrot.lane.b32.xlu1 %v2400_v7, %s2304_s18 }
  0x12   :  { %684 = vrot.lane.b32.xlu0 %v2400_v7, %s2305_s19  ;;  %686 = vrot.lane.b32.xlu1 %v2297_v2, %s2305_s19 }
  0x74   :  { %v2414_v8 = vpop.permute.xlu0 %45  ;;  %v2419_v11 = vpop.permute.xlu1 %322 }
  0x75   :  { %v48_v9 = vmul.f32 0.0, %v2414_v8  ;;  %v49_v10 = vmul.f32 %v2414_v8, %v2400_v7  ;;  %v325_v16 = vmul.f32 0.0, %v2419_v11  ;;  %v326_v17 = vmul.f32 %v2419_v11, %v2400_v7 }
  0x77   :  { %138 = vrot.lane.b32.xlu0 %v48_v9, %s2303_s15  ;;  %140 = vrot.lane.b32.xlu1 %v49_v10, %s2303_s15 }
  0x78   :  { %v2423_v12 = vpop.permute.xlu0 %225  ;;  %v2428_v15 = vpop.permute.xlu1 %495 }
  0x79   :  { %v228_v13 = vmul.f32 0.0, %v2423_v12  ;;  %v229_v14 = vmul.f32 %v2423_v12, %v2400_v7  ;;  %v498_v20 = vmul.f32 %v2428_v15, %v2400_v7  ;;  %v499_v21 = vmul.f32 0.0, %v2428_v15 }
  0x7b   :  { %234 = vrot.lane.b32.xlu0 %v228_v13, %s2302_s14  ;;  %236 = vrot.lane.b32.xlu1 %v229_v14, %s2302_s14 }
  0x7c   :  { %v2435_v18 = vpop.permute.xlu0 %592  ;;  %v2437_v19 = vpop.permute.xlu1 %772 }
  0x7d   :  { %v595_v27 = vmul.f32 %v2435_v18, %v2400_v7  ;;  %v596_v28 = vmul.f32 0.0, %v2435_v18  ;;  %v775_v29 = vmul.f32 %v2437_v19, %v2400_v7  ;;  %v776_v30 = vmul.f32 0.0, %v2437_v19 }
  0x7f   :  { %331 = vrot.lane.b32.xlu0 %v325_v16, %s2301_s28  ;;  %333 = vrot.lane.b32.xlu1 %v326_v17, %s2301_s28 }
  0x80   :  { %v2444_v22 = vpop.permute.xlu0 %55  ;;  %v58_v23 = vpop.permute.xlu1 %57 }
  0x81   :  { %v2448_v24 = vsel %vm59_vm1, %v2444_v22, %v58_v23 }
  0x82   :  { %2124 = vmatpush3.msra.mxu0 %v2448_v24 }
  0x83   :  { %504 = vrot.lane.b32.xlu0 %v498_v20, %s2299_s24  ;;  %506 = vrot.lane.b32.xlu1 %v499_v21, %s2299_s24 }
  0x84   :  { %2133 = vmatprep.subr.mxu0 %v2297_v2  ;;  %2126 = vmatmul.mubr.msk.f32.vlgmr.msra.gmra.mxu0 %vm62_vm2, %v2012_v25  ;;  %v685_v32 = vpop.permute.xlu0 %684  ;;  %v2477_v33 = vpop.permute.xlu1 %686 }
  0x85   :  { %2135 = vmatprep.mubr.msk.f32.mxu0 %vm2306_vm0, %v2297_v2  ;;  %v2538_v51 = vsel %vm688_vm7, %v685_v32, %v2477_v33 }
  0x87   :  { %601 = vrot.lane.b32.xlu0 %v595_v27, %s2300_s27  ;;  %603 = vrot.lane.b32.xlu1 %v596_v28, %s2300_s27 }
  0x8b   :  { %781 = vrot.lane.b32.xlu0 %v775_v29, %s2298_s21  ;;  %783 = vrot.lane.b32.xlu1 %v776_v30, %s2298_s21 }
  0x8f   :  { %865 = vperm.xlu0 %2285, %v2474_v31  }
  0xe9   :  { %v2479_v34 = vpop.permute.xlu0 %138  ;;  %v141_v35 = vpop.permute.xlu1 %140 }
  0xea   :  { %v143_v37 = vsel %vm142_vm3, %v2479_v34, %v141_v35 }
  0xeb   :  { %2129 = vmatpush3.msra.mxu1 %v143_v37 }
  0xec   :  { %2131 = vmatmul.mubr.msk.f32.vlgmr.msra.gmra.mxu1 %vm62_vm2, %v50_v36  ;;  %2138 = vmatprep.subr.mxu1 %v2297_v2 }
  0xed   :  { %v2488_v38 = vpop.permute.xlu0 %234  ;;  %v237_v39 = vpop.permute.xlu1 %236  ;;  %2140 = vmatprep.mubr.msk.f32.mxu1 %vm2306_vm0, %v2297_v2 }
  0xee   :  { %v2497_v41 = vsel %vm238_vm4, %v2488_v38, %v237_v39 }
  0xef   :  { %2134 = vmatpush3.msra.mxu0 %v2497_v41 }
  0xf0   :  { %2136 = vmatmul.mubr.msk.f32.vlgmr.msra.gmra.mxu0 %vm62_vm2, %v2017_v40  ;;  %2143 = vmatprep.subr.mxu0 %v2297_v2 }
  0xf1   :  { %v2502_v42 = vpop.permute.xlu0 %331  ;;  %v334_v43 = vpop.permute.xlu1 %333  ;;  %2144 = vmatpush3.msra.mxu0 %v2400_v7  ;;  %2145 = vmatprep.mubr.msk.f32.mxu0 %vm2306_vm0, %v2297_v2 }
  0xf2   :  { %v2512_v45 = vsel %vm335_vm5, %v2502_v42, %v334_v43  ;;  %2153 = vmatprep.subr.mxu0 %v2297_v2 }
  0xf3   :  { %2139 = vmatpush3.msra.mxu1 %v2512_v45 }
  0xf4   :  { %2141 = vmatmul.mubr.msk.f32.vlgmr.msra.gmra.mxu1 %vm62_vm2, %v2021_v44  ;;  %2148 = vmatprep.subr.mxu1 %v2297_v2 }
  0xf5   :  { %v505_v47 = vpop.permute.xlu0 %504  ;;  %v2521_v48 = vpop.permute.xlu1 %506  ;;  %2150 = vmatprep.mubr.msk.f32.mxu1 %vm2306_vm0, %v2297_v2  ;;  %2146 = vmatmul.mubr.msk.f32.vlgmr.msra.gmra.mxu0 %vm62_vm2, %v2023_v46 }
  0xf6   :  { %v2531_v50 = vsel %vm508_vm6, %v505_v47, %v2521_v48  ;;  %2155 = vmatprep.mubr.msk.f32.mxu0 %vm2306_vm0, %v2297_v2 }
  0xf7   :  { %2149 = vmatpush3.msra.mxu1 %v2531_v50 }
  0xf8   :  { %2151 = vmatmul.mubr.msk.f32.vlgmr.msra.gmra.mxu1 %vm62_vm2, %v2027_v49  ;;  %2158 = vmatprep.subr.mxu1 %v2297_v2  ;;  %v2308_v49 = vmov 1  }
  0xf9   :  { %v602_v52 = vpop.permute.xlu0 %601  ;;  %2159 = vmatpush3.msra.mxu1 %v2538_v51  ;;  %v2543_v53 = vpop.permute.xlu1 %603  ;;  %2160 = vmatprep.mubr.msk.f32.mxu1 %vm2306_vm0, %v2297_v2 }
  0xfa   :  { %v2555_v56 = vsel %vm605_vm8, %v602_v52, %v2543_v53  ;;  %2168 = vmatprep.subr.mxu1 %v2297_v2  ;;  %2286 = vset.pattern.permute.xlu0 %v2308_v49 }
  0xfb   :  { %2154 = vmatpush3.msra.mxu0 %v2555_v56 }
  0xfc   :  { %2156 = vmatmul.mubr.msk.f32.vlgmr.msra.gmra.mxu0 %vm62_vm2, %v2031_v54  ;;  %2161 = vmatmul.mubr.msk.f32.vlgmr.msra.gmra.mxu1 %vm62_vm2, %v2033_v55  ;;  %v2044_v55 = vld [vmem:[%s2899_s6 + $0x18] sm:$0xff] }
  0xfd   :  { %2169 = vmatpush3.msra.mxu1 %v2448_v24  ;;  %v782_v57 = vpop.permute.xlu0 %781  ;;  %v2562_v58 = vpop.permute.xlu1 %783  ;;  %2163 = vmatprep.subr.mxu0 %v2297_v2 }
  0xfe   :  { %v2570_v60 = vsel %vm785_vm9, %v782_v57, %v2562_v58  ;;  %2165 = vmatprep.mubr.msk.f32.mxu0 %vm2306_vm0, %v2297_v2  ;;  %2170 = vmatprep.subr.mxu1 %v2297_v2  ;;  %v2046_v57 = vld [vmem:[%s2899_s6 + $0x20] sm:$0xff] }
  0xff   :  { %2164 = vmatpush3.msra.mxu0 %v2570_v60  ;;  %2172 = vmatprep.mubr.msk.f32.mxu1 %vm2306_vm0, %v2297_v2 }
 0x100   :  { %2166 = vmatmul.mubr.msk.f32.vlgmr.msra.gmra.mxu0 %vm62_vm2, %v2037_v59  ;;  %2175 = vmatprep.subr.mxu0 %v2297_v2  ;;  %v2048_v59 = vld [vmem:[%s2899_s6 + $0x28] sm:$0xff] }
 0x101   :  { %2176 = vmatpush3.msra.mxu0 %v143_v37  ;;  %2179 = vmatprep.mubr.msk.f32.mxu0 %vm2306_vm0, %v2297_v2 }
 0x102   :  { %2177 = vmatprep.subr.mxu0 %v2297_v2 }
 0x10a   :  { %v866_v32 = vpop.permute.xlu0 %865 }
 0x144   :  { %v132_v61 = vpop.f32.mrf.mxu0 }
 0x146   :  { %v2127_v62 = vpop.f32.mrf.mxu0 }
 0x147   :  { %v2052_v62 = vld [vmem:[%s2899_s6 + $0x38] sm:$0xff] }
 0x1ac   :  { %v214_v63 = vpop.f32.mrf.mxu1 }
 0x1ad   :  { %v215_v0 = vadd.f32 %v214_v63, %v132_v61 }
 0x1ae   :  { %v2132_v1 = vpop.f32.mrf.mxu1 }
 0x1af   :  { %v1702_v1 = vld [vmem:[%s2902_s7 + $0x68] sm:$0xff] }
 0x1b0   :  { %v310_v3 = vpop.f32.mrf.mxu0 }
 0x1b1   :  { %v314_v4 = vadd.f32 %v310_v3, %v215_v0  ;;  %v1703_v0 = vld [vmem:[%s2902_s7 + $0x70] sm:$0xff]  ;;  %v1701_v3 = vld [vmem:[%s2902_s7 + $0x60] sm:$0xff] }
 0x1b2   :  { %v2137_v5 = vpop.f32.mrf.mxu0 }
 0x1b3   :  { %v1699_v5 = vld [vmem:[%s2902_s7 + $0x50] sm:$0xff] }
 0x1b4   :  { %v407_v6 = vpop.f32.mrf.mxu1 }
 0x1b5   :  { %v411_v9 = vadd.f32 %v407_v6, %v314_v4  ;;  %v483_v10 = vpop.f32.mrf.mxu0  ;;  %v1700_v4 = vld [vmem:[%s2902_s7 + $0x58] sm:$0xff]  ;;  %v1698_v6 = vld [vmem:[%s2902_s7 + $0x48] sm:$0xff] }
 0x1b6   :  { %v2142_v13 = vpop.f32.mrf.mxu1 }
 0x1b7   :  { %v487_v14 = vadd.f32 %v483_v10, %v411_v9  ;;  %v2147_v16 = vpop.f32.mrf.mxu0  ;;  %v1697_v9 = vld [vmem:[%s2902_s7 + $0x40] sm:$0xff]  ;;  %v1696_v10 = vld [vmem:[%s2902_s7 + $0x38] sm:$0xff]  ;;  %v1695_v13 = vld [vmem:[%s2902_s7 + $0x30] sm:$0xff] }
 0x1b8   :  { %v580_v17 = vpop.f32.mrf.mxu1  ;;  %v1693_v16 = vld [vmem:[%s2902_s7 + $0x20] sm:$0xff] }
 0x1b9   :  { %v584_v21 = vadd.f32 %v580_v17, %v487_v14  ;;  %v1694_v14 = vld [vmem:[%s2902_s7 + $0x28] sm:$0xff]  ;;  %v1692_v17 = vld [vmem:[%s2902_s7 + $0x18] sm:$0xff] }
 0x1ba   :  { %v2152_v20 = vpop.f32.mrf.mxu1 }
 0x1bb   :  { %v1691_v20 = vld [vmem:[%s2902_s7 + $0x10] sm:$0xff] }
 0x1bc   :  { %v677_v23 = vpop.f32.mrf.mxu0  ;;  %v760_v24 = vpop.f32.mrf.mxu1 }
 0x1bd   :  { %v681_v25 = vadd.f32 %v677_v23, %v584_v21  ;;  %v1690_v21 = vld [vmem:[%s2902_s7 + $0x8] sm:$0xff]  ;;  %v1689_v23 = vld [vmem:[%s2902_s7] sm:$0xff] }
 0x1be   :  { %v2157_v27 = vpop.f32.mrf.mxu0  ;;  %v2162_v28 = vpop.f32.mrf.mxu1 }
 0x1bf   :  { %v764_v29 = vadd.f32 %v760_v24, %v681_v25 }
 0x1c0   :  { %v857_v30 = vpop.f32.mrf.mxu0 }
 0x1c1   :  { %v861_v35 = vadd.f32 %v857_v30, %v764_v29 }
 0x1c2   :  { %v2167_v36 = vpop.f32.mrf.mxu0 }
 0x1c3   :  { %v868_v37 = vadd.f32 %v866_v32, %v861_v35 }
 0x1c5   :  { %v869_v39 = vmax.f32 %v868_v37, 0.0 }
 0x1c7   :  { %875 = vrot.lane.b32.xlu1 %v869_v39, %s2304_s18  ;;  %v1030_v40 = vmul.f32 %v869_v39, %v2423_v12  ;;  %v870_v43 = vmul.f32 %v869_v39, %v2414_v8  ;;  %v1270_v44 = vmul.f32 %v869_v39, %v2428_v15  ;;  %v1112_v46 = vmul.f32 %v869_v39, %v2419_v11  ;;  %v2039_v15 = vld [vmem:[%s2899_s6 + $0x8] sm:$0xff] }
 0x1c8   :  { %v1352_v47 = vmul.f32 %v869_v39, %v2435_v18  ;;  %v1514_v12 = vmul.f32 %v869_v39, %v2437_v19  ;;  %v2309_v8 = vmov 2  }
 0x1c9   :  { %1034 = vrot.lane.b32.xlu0 %v1030_v40, %s2302_s14  ;;  %2287 = vset.pattern.permute.xlu1 %v2309_v8 }
 0x1cb   :  { %953 = vrot.lane.b32.xlu1 %v870_v43, %s2303_s15 }
 0x1cd   :  { %1274 = vrot.lane.b32.xlu0 %v1270_v44, %s2299_s24 }
 0x1cf   :  { %1116 = vrot.lane.b32.xlu1 %v1112_v46, %s2301_s28 }
 0x1d1   :  { %1436 = vrot.lane.b32.xlu0 %v869_v39, %s2305_s19 }
 0x1d3   :  { %1356 = vrot.lane.b32.xlu1 %v1352_v47, %s2300_s27 }
 0x1d5   :  { %1597 = vperm.xlu0 %2286, %v2474_v31  }
 0x1d7   :  { %1518 = vrot.lane.b32.xlu1 %v1514_v12, %s2298_s21 }
 0x1db   :  { %1776 = vperm.xlu1 %2287, %v2474_v31  }
 0x1df   :  { %2289 = vset.pattern.permute.xlu1 %v2307_v26  ;;  %v871_v26 = vld [vmem:[%s2899_s6] sm:$0xff] }
 0x239   :  { %v876_v11 = vpop.permute.xlu1 %875 }
 0x23a   :  { %v877_v18 = vsel %vm59_vm1, %v2444_v22, %v876_v11 }
 0x23b   :  { %2171 = vmatpush3.msra.mxu1 %v877_v18  ;;  %v1035_v19 = vpop.permute.xlu0 %1034 }
 0x23c   :  { %2182 = vmatprep.subr.mxu1 %v2297_v2  ;;  %2173 = vmatmul.mubr.msk.f32.vlgmr.msra.gmra.mxu1 %vm59_vm1, %v2039_v15  ;;  %v1036_v54 = vsel %vm238_vm4, %v2488_v38, %v1035_v19 }
 0x23d   :  { %2183 = vmatpush3.msra.mxu1 %v2497_v41  ;;  %v954_v52 = vpop.permute.xlu1 %953  ;;  %2186 = vmatprep.mubr.msk.f32.mxu1 %vm2306_vm0, %v2297_v2  ;;  %v2042_v41 = vld [vmem:[%s2899_s6 + $0x10] sm:$0xff] }
 0x23e   :  { %v955_v22 = vsel %vm142_vm3, %v2479_v34, %v954_v52  ;;  %2184 = vmatprep.subr.mxu1 %v2297_v2 }
 0x23f   :  { %2185 = vmatpush3.msra.mxu1 %v1036_v54  ;;  %2178 = vmatpush3.msra.mxu0 %v955_v22 }
 0x240   :  { %2180 = vmatmul.mubr.msk.f32.vlgmr.msra.gmra.mxu0 %vm59_vm1, %v871_v26  ;;  %2189 = vmatprep.subr.mxu0 %v2297_v2 }
 0x241   :  { %2196 = vmatprep.subr.mxu1 %v2297_v2  ;;  %2187 = vmatmul.mubr.msk.f32.vlgmr.msra.gmra.mxu1 %vm59_vm1, %v2042_v41  ;;  %v1117_v38 = vpop.permute.xlu1 %1116 }
 0x242   :  { %2190 = vmatpush3.msra.mxu0 %v2512_v45  ;;  %2197 = vmatpush3.msra.mxu1 %v2400_v7  ;;  %v1118_v34 = vsel %vm335_vm5, %v2502_v42, %v1117_v38  ;;  %v1275_v42 = vpop.permute.xlu0 %1274 }
 0x243   :  { %2191 = vmatprep.subr.mxu0 %v2297_v2  ;;  %2198 = vmatprep.subr.mxu1 %v2297_v2  ;;  %v1276_v61 = vsel %vm508_vm6, %v1275_v42, %v2521_v48 }
 0x244   :  { %2199 = vmatpush3.msra.mxu1 %v869_v39  ;;  %2192 = vmatpush3.msra.mxu0 %v1118_v34 }
 0x245   :  { %2193 = vmatprep.mubr.msk.f32.mxu0 %vm2306_vm0, %v2297_v2  ;;  %2200 = vmatprep.mubr.msk.f32.mxu1 %vm2306_vm0, %v2297_v2  ;;  %v1357_v7 = vpop.permute.xlu1 %1356 }
 0x246   :  { %2194 = vmatmul.mubr.msk.f32.vlgmr.msra.gmra.mxu0 %vm59_vm1, %v2044_v55  ;;  %2203 = vmatprep.subr.mxu0 %v2297_v2  ;;  %v1358_v45 = vsel %vm605_vm8, %v1357_v7, %v2543_v53 }
 0x247   :  { %2210 = vmatprep.subr.mxu1 %v2297_v2  ;;  %2201 = vmatmul.mubr.msk.f32.vlgmr.msra.gmra.mxu1 %vm59_vm1, %v2046_v57 }
 0x248   :  { %2204 = vmatpush3.msra.mxu0 %v2531_v50  ;;  %2211 = vmatpush3.msra.mxu1 %v2555_v56  ;;  %v2050_v50 = vld [vmem:[%s2899_s6 + $0x30] sm:$0xff]  ;;  %v1437_v56 = vpop.permute.xlu0 %1436 }
 0x249   :  { %2205 = vmatprep.subr.mxu0 %v2297_v2  ;;  %2212 = vmatprep.subr.mxu1 %v2297_v2  ;;  %v1519_v53 = vpop.permute.xlu1 %1518  ;;  %v1438_v63 = vsel %vm688_vm7, %v1437_v56, %v2477_v33  ;;  %v1602_v33 = vld [vmem:[%s2901_s1] sm:$0xff] }
 0x24a   :  { %2206 = vmatpush3.msra.mxu0 %v1276_v61  ;;  %2207 = vmatprep.mubr.msk.f32.mxu0 %vm2306_vm0, %v2297_v2  ;;  %v1520_v48 = vsel %vm785_vm9, %v1519_v53, %v2562_v58  ;;  %v1603_v58 = vld [vmem:[%s2900_s2] sm:$0xff]  ;;  %v1808_v61 = vld [vmem:[%s2903_s9 + $0xc8] sm:$0xff] }
 0x24b   :  { %2213 = vmatpush3.msra.mxu1 %v1358_v45  ;;  %2208 = vmatmul.mubr.msk.f32.vlgmr.msra.gmra.mxu0 %vm59_vm1, %v2048_v59  ;;  %v1812_v45 = vld [vmem:[%s2903_s9 + $0xe8] sm:$0xff]  ;;  %v1811_v59 = vld [vmem:[%s2903_s9 + $0xe0] sm:$0xff] }
 0x24c   :  { %2214 = vmatprep.mubr.msk.f32.mxu1 %vm2306_vm0, %v2297_v2  ;;  %2217 = vmatprep.subr.mxu0 %v2297_v2  ;;  %v1804_v53 = vld [vmem:[%s2903_s9 + $0xa8] sm:$0xff]  ;;  %v1803_v56 = vld [vmem:[%s2903_s9 + $0xa0] sm:$0xff] }
 0x24d   :  { %2224 = vmatprep.subr.mxu1 %v2297_v2  ;;  %2215 = vmatmul.mubr.msk.f32.vlgmr.msra.gmra.mxu1 %vm59_vm1, %v2050_v50  ;;  %v1807_v50 = vld [vmem:[%s2903_s9 + $0xc0] sm:$0xff] }
 0x24e   :  { %2218 = vmatpush3.msra.mxu0 %v2538_v51  ;;  %2225 = vmatpush3.msra.mxu1 %v2570_v60  ;;  %v2054_v51 = vld [vmem:[%s2899_s6 + $0x40] sm:$0xff]  ;;  %v1704_v60 = vld [vmem:[%s2902_s7 + $0x78] sm:$0xff] }
 0x24f   :  { %2219 = vmatprep.subr.mxu0 %v2297_v2  ;;  %2226 = vmatprep.subr.mxu1 %v2297_v2 }
 0x250   :  { %2220 = vmatpush3.msra.mxu0 %v1438_v63  ;;  %2221 = vmatprep.mubr.msk.f32.mxu0 %vm2306_vm0, %v2297_v2  ;;  %v1598_v26 = vpop.permute.xlu0 %1597  ;;  %v1796_v63 = vld [vmem:[%s2903_s9 + $0x68] sm:$0xff] }
 0x251   :  { %2227 = vmatpush3.msra.mxu1 %v1520_v48  ;;  %2222 = vmatmul.mubr.msk.f32.vlgmr.msra.gmra.mxu0 %vm59_vm1, %v2052_v62  ;;  %v1800_v48 = vld [vmem:[%s2903_s9 + $0x88] sm:$0xff]  ;;  %v1799_v62 = vld [vmem:[%s2903_s9 + $0x80] sm:$0xff] }
 0x252   :  { %2228 = vmatprep.mubr.msk.f32.mxu1 %vm2306_vm0, %v2297_v2  ;;  %2231 = vmatprep.subr.mxu0 %v2297_v2 }
 0x253   :  { %2229 = vmatmul.mubr.msk.f32.vlgmr.msra.gmra.mxu1 %vm59_vm1, %v2054_v51  ;;  %2232 = vmatpush3.msra.mxu0 %v1603_v58  ;;  %v1795_v51 = vld [vmem:[%s2903_s9 + $0x60] sm:$0xff]  ;;  %v1792_v58 = vld [vmem:[%s2903_s9 + $0x48] sm:$0xff] }
 0x254   :  { %2233 = vmatprep.mubr.msk.f32.mxu0 %vm2306_vm0, %v2297_v2  ;;  %2236 = vmatprep.subr.mxu1 %v2297_v2 }
 0x255   :  { %2234 = vmatmul.mubr.msk.f32.vlgmr.msra.gmra.mxu0 %vm62_vm2, %v1602_v33  ;;  %2237 = vmatpush3.msra.mxu1 %v1704_v60  ;;  %v1791_v33 = vld [vmem:[%s2903_s9 + $0x40] sm:$0xff]  ;;  %v1788_v60 = vld [vmem:[%s2903_s9 + $0x28] sm:$0xff] }
 0x256   :  { %2238 = vmatprep.subr.mxu1 %v2297_v2  ;;  %2268 = vmatprep.mubr.msk.f32.mxu1 %vm2306_vm0, %v2297_v2 }
 0x257   :  { %2239 = vmatpush3.msra.mxu1 %v1703_v0  ;;  %1883 = vmatprep.mubr.f32.mxu0 %v2297_v2  ;;  %v1787_v0 = vld [vmem:[%s2903_s9 + $0x20] sm:$0xff] }
 0x258   :  { %2240 = vmatprep.subr.mxu1 %v2297_v2  ;;  %1835 = vmatprep.subr.mxu0 %v1812_v45 }
 0x259   :  { %2241 = vmatpush3.msra.mxu1 %v1702_v1  ;;  %1836 = vmatpush1.msra.mxu0 %v1811_v59  ;;  %v1784_v1 = vld [vmem:[%s2903_s9 + $0x8] sm:$0xff] }
 0x25a   :  { %2242 = vmatprep.subr.mxu1 %v2297_v2  ;;  %1837 = vmatprep.subr.mxu0 %v1808_v61 }
 0x25b   :  { %2243 = vmatpush3.msra.mxu1 %v1701_v3  ;;  %1838 = vmatpush1.msra.mxu0 %v1807_v50  ;;  %v1783_v3 = vld [vmem:[%s2903_s9] sm:$0xff] }
 0x25c   :  { %2244 = vmatprep.subr.mxu1 %v2297_v2  ;;  %1839 = vmatprep.subr.mxu0 %v1804_v53  ;;  %v1972_v53 = vld [vmem:[%s2905_s10 + $0x18] sm:$0xff] }
 0x25d   :  { %2245 = vmatpush3.msra.mxu1 %v1700_v4  ;;  %1840 = vmatpush1.msra.mxu0 %v1803_v56  ;;  %v1814_v4 = vld [vmem:[%s2903_s9 + $0xf8] sm:$0xff] }
 0x25e   :  { %2246 = vmatprep.subr.mxu1 %v2297_v2  ;;  %1841 = vmatprep.subr.mxu0 %v1800_v48 }
 0x25f   :  { %2247 = vmatpush3.msra.mxu1 %v1699_v5  ;;  %1842 = vmatpush1.msra.mxu0 %v1799_v62  ;;  %v2310_v5 = vmov 3  }
 0x260   :  { %2248 = vmatprep.subr.mxu1 %v2297_v2  ;;  %1843 = vmatprep.subr.mxu0 %v1796_v63 }
 0x261   :  { %2249 = vmatpush3.msra.mxu1 %v1698_v6  ;;  %1844 = vmatpush1.msra.mxu0 %v1795_v51  ;;  %v1777_v6 = vpop.permute.xlu1 %1776 }
 0x262   :  { %2250 = vmatprep.subr.mxu1 %v2297_v2  ;;  %1845 = vmatprep.subr.mxu0 %v1792_v58 }
 0x263   :  { %2251 = vmatpush3.msra.mxu1 %v1697_v9  ;;  %1846 = vmatpush1.msra.mxu0 %v1791_v33 }
 0x264   :  { %2252 = vmatprep.subr.mxu1 %v2297_v2  ;;  %1847 = vmatprep.subr.mxu0 %v1788_v60 }
 0x265   :  { %2253 = vmatpush3.msra.mxu1 %v1696_v10  ;;  %1848 = vmatpush1.msra.mxu0 %v1787_v0 }
 0x266   :  { %2254 = vmatprep.subr.mxu1 %v2297_v2  ;;  %1849 = vmatprep.subr.mxu0 %v1784_v1 }
 0x267   :  { %2255 = vmatpush3.msra.mxu1 %v1695_v13  ;;  %1850 = vmatpush1.msra.mxu0 %v1783_v3 }
 0x268   :  { %2256 = vmatprep.subr.mxu1 %v2297_v2  ;;  %1906 = vmatprep.subr.mxu0 %v1814_v4 }
 0x269   :  { %2257 = vmatpush3.msra.mxu1 %v1694_v14  ;;  %2288 = vset.pattern.permute.xlu0 %v2310_v5 }
 0x26a   :  { %2258 = vmatprep.subr.mxu1 %v2297_v2 }
 0x26b   :  { %2259 = vmatpush3.msra.mxu1 %v1693_v16 }
 0x26c   :  { %2260 = vmatprep.subr.mxu1 %v2297_v2 }
 0x26d   :  { %2261 = vmatpush3.msra.mxu1 %v1692_v17 }
 0x26e   :  { %2262 = vmatprep.subr.mxu1 %v2297_v2 }
 0x26f   :  { %2263 = vmatpush3.msra.mxu1 %v1691_v20  ;;  %v1780_v20 = vld [vmem:[%s2904_s8] sm:$0xff] }
 0x270   :  { %2264 = vmatprep.subr.mxu1 %v2297_v2 }
 0x271   :  { %2265 = vmatpush3.msra.mxu1 %v1690_v21 }
 0x272   :  { %2266 = vmatprep.subr.mxu1 %v2297_v2 }
 0x273   :  { %2267 = vmatpush3.msra.mxu1 %v1689_v23 }
 0x2fc   :  { %v948_v24 = vpop.f32.mrf.mxu1 }
 0x2fe   :  { %v2174_v25 = vpop.f32.mrf.mxu1 }
 0x300   :  { %v1026_v27 = vpop.f32.mrf.mxu0 }
 0x301   :  { %v1027_v28 = vadd.f32 %v1026_v27, %v948_v24  ;;  %v1107_v29 = vpop.f32.mrf.mxu1  ;;  %v1813_v27 = vld [vmem:[%s2903_s9 + $0xf0] sm:$0xff] }
 0x302   :  { %v2181_v30 = vpop.f32.mrf.mxu0 }
 0x303   :  { %v1111_v32 = vadd.f32 %v1107_v29, %v1027_v28  ;;  %v2188_v35 = vpop.f32.mrf.mxu1  ;;  %v1810_v28 = vld [vmem:[%s2903_s9 + $0xd8] sm:$0xff]  ;;  %v1805_v30 = vld [vmem:[%s2903_s9 + $0xb0] sm:$0xff] }
 0x304   :  { %v1806_v29 = vld [vmem:[%s2903_s9 + $0xb8] sm:$0xff]  ;;  %v1801_v35 = vld [vmem:[%s2903_s9 + $0x90] sm:$0xff] }
 0x306   :  { %v1189_v36 = vpop.f32.mrf.mxu0 }
 0x307   :  { %v1193_v37 = vadd.f32 %v1189_v36, %v1111_v32  ;;  %v1265_v39 = vpop.f32.mrf.mxu1  ;;  %v1802_v32 = vld [vmem:[%s2903_s9 + $0x98] sm:$0xff]  ;;  %v1797_v36 = vld [vmem:[%s2903_s9 + $0x70] sm:$0xff] }
 0x308   :  { %v2195_v40 = vpop.f32.mrf.mxu0 }
 0x309   :  { %v1269_v43 = vadd.f32 %v1265_v39, %v1193_v37  ;;  %v2202_v44 = vpop.f32.mrf.mxu1  ;;  %v1794_v37 = vld [vmem:[%s2903_s9 + $0x58] sm:$0xff]  ;;  %v1793_v39 = vld [vmem:[%s2903_s9 + $0x50] sm:$0xff] }
 0x30a   :  { %v1790_v40 = vld [vmem:[%s2903_s9 + $0x38] sm:$0xff] }
 0x30b   :  { %v1347_v46 = vpop.f32.mrf.mxu0  ;;  %v1786_v44 = vld [vmem:[%s2903_s9 + $0x18] sm:$0xff] }
 0x30c   :  { %v1351_v47 = vadd.f32 %v1347_v46, %v1269_v43  ;;  %v1789_v43 = vld [vmem:[%s2903_s9 + $0x30] sm:$0xff] }
 0x30d   :  { %v2209_v12 = vpop.f32.mrf.mxu0  ;;  %v1429_v11 = vpop.f32.mrf.mxu1  ;;  %v1785_v46 = vld [vmem:[%s2903_s9 + $0x10] sm:$0xff] }
 0x30e   :  { %v1433_v15 = vadd.f32 %v1429_v11, %v1351_v47 }
 0x30f   :  { %v2216_v18 = vpop.f32.mrf.mxu1 }
 0x311   :  { %v1509_v19 = vpop.f32.mrf.mxu0 }
 0x312   :  { %v1513_v52 = vadd.f32 %v1509_v19, %v1433_v15 }
 0x313   :  { %v2223_v54 = vpop.f32.mrf.mxu0  ;;  %v1591_v22 = vpop.f32.mrf.mxu1 }
 0x314   :  { %v1595_v41 = vadd.f32 %v1591_v22, %v1513_v52 }
 0x315   :  { %v1673_v38 = vpop.f32.mrf.mxu0  ;;  %v2230_v34 = vpop.f32.mrf.mxu1 }
 0x316   :  { %v2766_v55 = vadd.f32 %v1598_v26, %v1595_v41  ;;  %v1678_v57 = vsel %vm1677_vm10, %v1673_v38, -inf  ;;  %v1969_v26 = vld [vmem:[%s2905_s10] sm:$0xff]  ;;  %v1971_v34 = vld [vmem:[%s2905_s10 + $0x10] sm:$0xff] }
 0x317   :  { %1679 = vmax.xlane.f32.xlu1 %v1678_v57  ;;  %v2235_v7 = vpop.f32.mrf.mxu0 }
 0x318   :  { %v1601_v42 = vmax.f32 %v2766_v55, 0.0 }
 0x31a   :  { %2269 = vmatmul.mubr.f32.vlgmr.msra.gmra.mxu1 %v1601_v42 }
 0x3a0   :  { %v1680_v9 = vpop.xlane.xlu1 %1679 }
 0x3a1   :  { %v1681_v10 = vsub.f32 %v1673_v38, %v1680_v9 }
 0x3a3   :  { %v1682_v13 = vmul.f32 1.442695, %v1681_v10 }
 0x3a5   :  { %2293 = vpow2.f32 %v1682_v13 }
 0x3b2   :  { %v2294_v14 = vpop.eup %2293 }
 0x3b3   :  { %v1684_v16 = vsel %vm1677_vm10, %v2294_v14, 0.0 }
 0x3b4   :  { %1685 = vadd.xlane.f32.xlu0 %v1684_v16 }
 0x3ca   :  { %1962 = vperm.xlu0 %2288, %v2474_v31   ;;  %v1809_v31 = vld [vmem:[%s2903_s9 + $0xd0] sm:$0xff] }
 0x3da   :  { %v1771_v17 = vpop.f32.mrf.mxu1 }
 0x3db   :  { %v1779_v21 = vmul.f32 %v1777_v6, %v1771_v17 }
 0x3dc   :  { %v2270_v23 = vpop.f32.mrf.mxu1 }
 0x3dd   :  { %v1781_v24 = vadd.f32 %v1780_v20, %v1779_v21 }
 0x3df   :  { %v1782_v25 = vmax.f32 %v1781_v24, 0.0 }
 0x3e1   :  { %2057 = vmatmul.mubr.msk.f32.vlgmr.msra.gmra.mxu0 %vm1815_vm11, %v1782_v25 }
 0x3e2   :  { %1907 = vmatpush1.msra.mxu0 %v1813_v27  ;;  %1954 = vmatprep.mubr.f32.mxu0 %v2297_v2  ;;  %v1798_v2 = vld [vmem:[%s2903_s9 + $0x78] sm:$0xff] }
 0x3e3   :  { %1908 = vmatprep.subr.mxu0 %v1810_v28 }
 0x3e4   :  { %1909 = vmatpush1.msra.mxu0 %v1809_v31 }
 0x3e5   :  { %1910 = vmatprep.subr.mxu0 %v1806_v29 }
 0x3e6   :  { %1911 = vmatpush1.msra.mxu0 %v1805_v30 }
 0x3e7   :  { %1912 = vmatprep.subr.mxu0 %v1802_v32 }
 0x3e8   :  { %1913 = vmatpush1.msra.mxu0 %v1801_v35 }
 0x3e9   :  { %1914 = vmatprep.subr.mxu0 %v1798_v2 }
 0x3ea   :  { %1915 = vmatpush1.msra.mxu0 %v1797_v36 }
 0x3eb   :  { %1916 = vmatprep.subr.mxu0 %v1794_v37 }
 0x3ec   :  { %1917 = vmatpush1.msra.mxu0 %v1793_v39 }
 0x3ed   :  { %1918 = vmatprep.subr.mxu0 %v1790_v40 }
 0x3ee   :  { %1919 = vmatpush1.msra.mxu0 %v1789_v43 }
 0x3ef   :  { %1920 = vmatprep.subr.mxu0 %v1786_v44 }
 0x3f0   :  { %1921 = vmatpush1.msra.mxu0 %v1785_v46 }
 0x3f1   :  { %2058 = vmatmul.mubr.msk.f32.vlgmr.msra.gmra.mxu0 %vm1815_vm11, %v1782_v25 }
 0x43d   :  { %v1686_v47 = vpop.xlane.xlu0 %1685 }
 0x43e   :  { %2295 = vrcp.f32 %v1686_v47 }
 0x445   :  { %v1963_v18 = vpop.permute.xlu0 %1962 }
 0x44b   :  { %v2296_v12 = vpop.eup %2295 }
 0x44c   :  { %v1688_v11 = vmul.f32 %v2296_v12, %v2294_v14 }
 0x44e   :  { %1983 = vperm.xlu1 %2289, %v1688_v11  }
 0x452   :  { %2290 = vset.pattern.permute.xlu1 %v2308_v49  ;;  %v1970_v49 = vld [vmem:[%s2905_s10 + $0x8] sm:$0xff] }
 0x453   :  { %1989 = vperm.xlu1 %2290, %v1688_v11  }
 0x457   :  { %2291 = vset.pattern.permute.xlu1 %v2309_v8 }
 0x458   :  { %1995 = vperm.xlu1 %2291, %v1688_v11  }
 0x45c   :  { %2292 = vset.pattern.permute.xlu1 %v2310_v5 }
 0x45d   :  { %2001 = vperm.xlu1 %2292, %v1688_v11  }
 0x4a1   :  { %v1885_v15 = vpop.f32.mrf.mxu0 }
 0x4a2   :  { %v1965_v52 = vmul.f32 %v1963_v18, %v1885_v15 }
 0x4a3   :  { %v1887_v19 = vpop.f32.mrf.mxu0 }
 0x4a4   :  { %v1966_v22 = vmul.f32 %v1963_v18, %v1887_v19  ;;  %v1973_v38 = vadd.f32 %v1969_v26, %v1965_v52 }
 0x4a6   :  { %v1974_v7 = vadd.f32 %v1970_v49, %v1966_v22  ;;  %v1977_v50 = vmax.f32 %v1973_v38, 0.0 }
 0x4a8   :  { %v1978_v48 = vmax.f32 %v1974_v7, 0.0 }
 0x4b1   :  { %v1956_v54 = vpop.f32.mrf.mxu0 }
 0x4b2   :  { %v1967_v8 = vmul.f32 %v1963_v18, %v1956_v54 }
 0x4b3   :  { %v1958_v57 = vpop.f32.mrf.mxu0 }
 0x4b4   :  { %v1975_v59 = vadd.f32 %v1971_v34, %v1967_v8  ;;  %v1968_v61 = vmul.f32 %v1963_v18, %v1958_v57 }
 0x4b6   :  { %v1976_v62 = vadd.f32 %v1972_v53, %v1968_v61  ;;  %v1979_v58 = vmax.f32 %v1975_v59, 0.0 }
 0x4b8   :  { %v1980_v1 = vmax.f32 %v1976_v62, 0.0 }
 0x4c9   :  { %v1984_v41 = vpop.permute.xlu1 %1983 }
 0x4ca   :  { %v1986_v56 = vmul.f32 %v1984_v41, %v1977_v50 }
 0x4cc   :  { %v1987_v33 = vadd.f32 %v1986_v56, %v1601_v42 }
 0x4ce   :  { %v1990_v45 = vpop.permute.xlu1 %1989 }
 0x4cf   :  { %v1992_v63 = vmul.f32 %v1990_v45, %v1978_v48 }
 0x4d1   :  { %v1993_v0 = vadd.f32 %v1992_v63, %v1987_v33 }
 0x4d3   :  { %v1996_v51 = vpop.permute.xlu1 %1995 }
 0x4d4   :  { %v1998_v60 = vmul.f32 %v1996_v51, %v1979_v58 }
 0x4d6   :  { %v1999_v4 = vadd.f32 %v1998_v60, %v1993_v0 }
 0x4d8   :  { %v2002_v3 = vpop.permute.xlu1 %2001 }
 0x4d9   :  { %v2004_v5 = vmul.f32 %v2002_v3, %v1980_v1 }
 0x4db   :  { %v2005_v6 = vadd.f32 %v2004_v5, %v1999_v4 }
 0x4dd   :  { %2006 = vst [vmem:[%s2906_s11] sm:$0xff] %v2005_v6 }

</bundles_post_ra>
